<compile_context>
chip_gen: v5e
topology: v5e:2x2
jax: 0.10.0
libtpu: 0.0.40
codegen_flags: <defaults>
</compile_context>

<pallas_src>
import functools

import jax
import jax.numpy as jnp
import numpy as np
from jax import lax
from jax.experimental import pallas as pl
from jax.experimental.pallas import tpu as pltpu


def _round_up(x, m):
    return ((x + m - 1) // m) * m


# --------------------------------------------------------------------------
# Fused kernel: per chunk: gates_x = x @ Wx + b  (one matmul), then the serial
# recurrence h,c over the chunk (only h @ Wh per step), FC fused in the epilogue.
# Gate column order is [i | f | o | g] (repacked host-side from PyTorch [i,f,g,o]).
# --------------------------------------------------------------------------
def _lstm_fused_kernel(x_ref, wx_ref, b_ref, wh_ref, wfc_ref, bfc_ref,
                       out_ref, gx_scr, h_scr, c_scr,
                       *, hidden, chunk, seq_len, ragged, unroll):
    c_idx = pl.program_id(1)
    last = pl.num_programs(1) - 1

    @pl.when(c_idx == 0)
    def _():
        h_scr[...] = jnp.zeros_like(h_scr)
        c_scr[...] = jnp.zeros_like(c_scr)

    # ---- chunk input projection (hoisted out of the step loop) ----
    tc, tb, ii = x_ref.shape
    x2d = x_ref[...].reshape(tc * tb, ii)                         # bf16, layout-preserving (tb % 8 == 0)
    gx = jnp.dot(x2d, wx_ref[...], preferred_element_type=jnp.float32) + b_ref[...]
    gx_scr[...] = gx.reshape(tc, tb, 4 * hidden)                  # f32, stays in VMEM

    # ---- serial recurrence over the chunk ----
    def make_step(masked):
        def step(s, carry):
            h, c = carry
            gates = gx_scr[s] + jnp.dot(h.astype(jnp.bfloat16), wh_ref[...],
                                        preferred_element_type=jnp.float32)
            # [i | f | o] are one contiguous sigmoid slab; g is the tanh slab.
            sig = jax.nn.sigmoid(gates[:, 0:3 * hidden])
            i_g = sig[:, 0 * hidden:1 * hidden]
            f_g = sig[:, 1 * hidden:2 * hidden]
            o_g = sig[:, 2 * hidden:3 * hidden]
            g_g = jnp.tanh(gates[:, 3 * hidden:4 * hidden])
            c_new = f_g * c + i_g * g_g
            h_new = o_g * jnp.tanh(c_new)
            if masked:
                valid = (c_idx * chunk + s) < seq_len
                h_new = jnp.where(valid, h_new, h)
                c_new = jnp.where(valid, c_new, c)
            return h_new, c_new
        return step

    def run_chunk(masked):
        h, c = lax.fori_loop(0, chunk, make_step(masked),
                             (h_scr[...], c_scr[...]), unroll=unroll)
        h_scr[...] = h
        c_scr[...] = c

    if ragged:
        # Pay the freeze selects only in the (possibly partial) last chunk.
        @pl.when(c_idx == last)
        def _():
            run_chunk(True)

        @pl.when(c_idx != last)
        def _():
            run_chunk(False)
    else:
        run_chunk(False)

    # ---- fused final Linear on h_T (last chunk epilogue) ----
    @pl.when(c_idx == last)
    def _():
        out_ref[...] = (jnp.dot(h_scr[...].astype(jnp.bfloat16), wfc_ref[...],
                                preferred_element_type=jnp.float32)
                        + bfc_ref[...]).astype(out_ref.dtype)


# --------------------------------------------------------------------------
# Wrapper
# --------------------------------------------------------------------------
def lstm_forward(x, w_ih, w_hh, b_ih, b_hh, w_fc, b_fc, *, time_chunk=32):
    """x: (B, T, I); PyTorch weights: w_ih (4H, I), w_hh (4H, H),
       b_ih/b_hh (4H,), w_fc (O, H), b_fc (O,).  Returns (B, O) float32."""
    B, T, I = x.shape
    H = w_hh.shape[1]
    O = w_fc.shape[0]

    SUB, LANE = 8, 128
    Hp = _round_up(H, LANE)            # lane-padded hidden (per gate)
    Op = _round_up(O, LANE)            # lane-padded output
    Ip = _round_up(I, SUB)             # sublane-padded input feature dim

    # Batch block: single fat block unless B is huge (keeps MXU rows occupied and
    # avoids a serial batch grid on single-TC chips).
    Bp0 = _round_up(B, SUB)
    MAX_TB = 256
    if Bp0 <= MAX_TB:
        TB, n_bblocks = Bp0, 1
    else:
        n_bblocks = (Bp0 + MAX_TB - 1) // MAX_TB
        TB = _round_up((Bp0 + n_bblocks - 1) // n_bblocks, SUB)
    Bp = TB * n_bblocks

    TC = max(1, min(time_chunk, T))    # time chunk
    Tp = _round_up(T, TC)
    n_chunks = Tp // TC
    ragged = (T % TC) != 0

    # Partial unroll when the h/c carries get large (vreg pressure), full otherwise.
    carry_bytes = 2 * TB * Hp * 4
    unroll = True if carry_bytes <= (64 << 10) else 2

    f32, bf16 = jnp.float32, jnp.bfloat16

    w_ih = w_ih.astype(f32)
    w_hh = w_hh.astype(f32)
    bias = (b_ih + b_hh).astype(f32)

    # Repack PyTorch row-stacked [i, f, g, o] weights into lane-padded, right-multiply
    # form with column order [i, f, o, g] (three sigmoids contiguous).  Padded gate
    # columns get zero weight & bias so padded hidden state stays inert.
    perm = (0, 1, 3, 2)                # column slot k <- PyTorch gate perm[k]

    def pack_gate_matrix(w, rows, rows_p):
        out = jnp.zeros((rows_p, 4 * Hp), f32)
        for k, src in enumerate(perm):
            out = out.at[:rows, k * Hp:k * Hp + H].set(w[src * H:(src + 1) * H, :].T)
        return out.astype(bf16)

    wx_p = pack_gate_matrix(w_ih, I, Ip)       # (Ip, 4Hp)  bf16
    wh_p = pack_gate_matrix(w_hh, H, Hp)       # (Hp, 4Hp)  bf16

    b_p = jnp.zeros((1, 4 * Hp), f32)
    for k, src in enumerate(perm):
        b_p = b_p.at[0, k * Hp:k * Hp + H].set(bias[src * H:(src + 1) * H])

    wfc_p = jnp.zeros((Hp, Op), f32).at[:H, :O].set(w_fc.astype(f32).T).astype(bf16)
    bfc_p = jnp.zeros((1, Op), f32).at[0, :O].set(b_fc.astype(f32))

    # (B, T, I) -> time-major, padded, bf16 (only x travels through HBM now).
    x_tbi = jnp.transpose(x.astype(bf16), (1, 0, 2))
    x_p = jnp.zeros((Tp, Bp, Ip), bf16).at[:T, :B, :I].set(x_tbi)

    # Explicit VMEM budget (resident weights + chunk buffers + scratch).
    resident = (Hp * 4 * Hp + Ip * 4 * Hp + Hp * Op) * 2 + (4 * Hp + Op) * 4
    buffers = (2 * TC * TB * Ip * 2          # double-buffered x chunk (bf16)
               + TC * TB * 4 * Hp * 4        # gates_x scratch (f32)
               + 2 * TB * Hp * 4             # h/c scratch (f32)
               + 2 * TB * Op * 4)            # output block
    vmem_limit = int(min(max(resident + buffers + (4 << 20), 8 << 20), 96 << 20))

    out_p = pl.pallas_call(
        functools.partial(_lstm_fused_kernel, hidden=Hp, chunk=TC, seq_len=T,
                          ragged=ragged, unroll=unroll),
        out_shape=jax.ShapeDtypeStruct((Bp, Op), f32),
        grid_spec=pltpu.PrefetchScalarGridSpec(
            num_scalar_prefetch=0,
            grid=(n_bblocks, n_chunks),
            in_specs=[
                pl.BlockSpec((TC, TB, Ip), lambda b, c: (c, b, 0)),        # x chunk
                pl.BlockSpec(memory_space=pltpu.MemorySpace.VMEM),          # Wx resident
                pl.BlockSpec(memory_space=pltpu.MemorySpace.VMEM),          # fused bias
                pl.BlockSpec(memory_space=pltpu.MemorySpace.VMEM),          # Wh resident
                pl.BlockSpec(memory_space=pltpu.MemorySpace.VMEM),          # W_fc resident
                pl.BlockSpec(memory_space=pltpu.MemorySpace.VMEM),          # b_fc resident
            ],
            out_specs=pl.BlockSpec((TB, Op), lambda b, c: (b, 0)),
            scratch_shapes=[
                pltpu.VMEM((TC, TB, 4 * Hp), f32),   # per-chunk gates_x
                pltpu.VMEM((TB, Hp), f32),           # h
                pltpu.VMEM((TB, Hp), f32),           # c
            ],
        ),
        compiler_params=pltpu.CompilerParams(
            dimension_semantics=("parallel", "arbitrary"),
            vmem_limit_bytes=vmem_limit),
    )(x_p, wx_p, b_p, wh_p, wfc_p, bfc_p)

    return out_p[:B, :O]


# --------------------------------------------------------------------------
# Pure-JAX reference of the PyTorch module forward (f32 throughout)
# --------------------------------------------------------------------------
def lstm_reference(x, w_ih, w_hh, b_ih, b_hh, w_fc, b_fc):
    B, T, I = x.shape
    H = w_hh.shape[1]

    def step(carry, x_t):
        h, c = carry
        gates = x_t @ w_ih.T + b_ih + h @ w_hh.T + b_hh
        i = jax.nn.sigmoid(gates[:, 0:H])
        f = jax.nn.sigmoid(gates[:, H:2 * H])
        g = jnp.tanh(gates[:, 2 * H:3 * H])
        o = jax.nn.sigmoid(gates[:, 3 * H:4 * H])
        c = f * c + i * g
        h = o * jnp.tanh(c)
        return (h, c), h

    h0 = jnp.zeros((B, H), jnp.float32)
    c0 = jnp.zeros((B, H), jnp.float32)
    (hT, _), _ = lax.scan(step, (h0, c0), jnp.transpose(x, (1, 0, 2)))
    return hT @ w_fc.T + b_fc


if __name__ == "__main__":
    B, T, I, H, O = 2, 8, 16, 32, 8

    key = jax.random.PRNGKey(0)
    ks = jax.random.split(key, 7)
    scale = 1.0 / np.sqrt(H)
    w_ih = jax.random.uniform(ks[0], (4 * H, I), jnp.float32, -scale, scale)
    w_hh = jax.random.uniform(ks[1], (4 * H, H), jnp.float32, -scale, scale)
    b_ih = jax.random.uniform(ks[2], (4 * H,), jnp.float32, -scale, scale)
    b_hh = jax.random.uniform(ks[3], (4 * H,), jnp.float32, -scale, scale)
    w_fc = jax.random.uniform(ks[4], (O, H), jnp.float32, -scale, scale)
    b_fc = jax.random.uniform(ks[5], (O,), jnp.float32, -scale, scale)
    x = jax.random.normal(ks[6], (B, T, I), jnp.float32)

    out = lstm_forward(x, w_ih, w_hh, b_ih, b_hh, w_fc, b_fc)
    out = jax.block_until_ready(out)

    ref = lstm_reference(x, w_ih, w_hh, b_ih, b_hh, w_fc, b_fc)
    # Matmul operands are bf16 (MXU-native) with f32 accumulation -> relaxed tolerance.
    np.testing.assert_allclose(np.asarray(out), np.asarray(ref),
                               rtol=2e-2, atol=2e-2)
    print("KERNEL_OK")
</pallas_src>

<mosaic_0001>
module attributes {stable_mosaic.version = 11 : i64} {
  func.func @_lstm_fused_kernel(%arg0: i32, %arg1: i32, %arg2: memref<8x8x16xbf16, #tpu.memory_space<vmem>>, %arg3: memref<16x512xbf16, #tpu.memory_space<vmem>>, %arg4: memref<1x512xf32, #tpu.memory_space<vmem>>, %arg5: memref<128x512xbf16, #tpu.memory_space<vmem>>, %arg6: memref<128x128xbf16, #tpu.memory_space<vmem>>, %arg7: memref<1x128xf32, #tpu.memory_space<vmem>>, %arg8: memref<8x128xf32, #tpu.memory_space<vmem>>, %arg9: memref<8x8x512xf32, #tpu.memory_space<vmem>>, %arg10: memref<8x128xf32, #tpu.memory_space<vmem>>, %arg11: memref<8x128xf32, #tpu.memory_space<vmem>>) attributes {dimension_semantics = [#tpu.dimension_semantics<parallel>, #tpu.dimension_semantics<arbitrary>], iteration_bounds = array<i64: 1, 1>, scalar_prefetch = 0 : i64, scratch_operands = 3 : i64, tpu.core_type = #tpu.core_type<tc>, window_params = [{transform_indices = @transform_0, window_bounds = array<i64: 8, 8, 16>}, {pipeline_mode = #tpu.pipeline_mode<synchronous>, transform_indices = @transform_1, window_bounds = array<i64: 16, 512>}, {pipeline_mode = #tpu.pipeline_mode<synchronous>, transform_indices = @transform_2, window_bounds = array<i64: 1, 512>}, {pipeline_mode = #tpu.pipeline_mode<synchronous>, transform_indices = @transform_3, window_bounds = array<i64: 128, 512>}, {pipeline_mode = #tpu.pipeline_mode<synchronous>, transform_indices = @transform_4, window_bounds = array<i64: 128, 128>}, {pipeline_mode = #tpu.pipeline_mode<synchronous>, transform_indices = @transform_5, window_bounds = array<i64: 1, 128>}, {transform_indices = @transform_6, window_bounds = array<i64: 8, 128>}]} {
    %c0_i32 = arith.constant 0 : i32
    %0 = arith.cmpi eq, %arg1, %c0_i32 : i32
    %1 = arith.extui %0 : i1 to i32
    %c0_i32_0 = arith.constant 0 : i32
    %2 = arith.cmpi ne, %1, %c0_i32_0 : i32
    scf.if %2 {
      %cst_69 = arith.constant 0.000000e+00 : f32
      %203 = vector.broadcast %cst_69 : f32 to vector<8x128xf32>
      %c0_70 = arith.constant 0 : index
      %c0_71 = arith.constant 0 : index
      %204 = vector.load %arg10[%c0_70, %c0_71] : memref<8x128xf32, #tpu.memory_space<vmem>>, vector<8x128xf32>
      tpu.vector_store %arg10[%c0_70, %c0_71], %203 {strides = array<i32>} : memref<8x128xf32, #tpu.memory_space<vmem>>, vector<8x128xf32>,
      %cst_72 = arith.constant 0.000000e+00 : f32
      %205 = vector.broadcast %cst_72 : f32 to vector<8x128xf32>
      %c0_73 = arith.constant 0 : index
      %c0_74 = arith.constant 0 : index
      %206 = vector.load %arg11[%c0_73, %c0_74] : memref<8x128xf32, #tpu.memory_space<vmem>>, vector<8x128xf32>
      tpu.vector_store %arg11[%c0_73, %c0_74], %205 {strides = array<i32>} : memref<8x128xf32, #tpu.memory_space<vmem>>, vector<8x128xf32>,
    } else {
    }
    %c0 = arith.constant 0 : index
    %c0_1 = arith.constant 0 : index
    %c0_2 = arith.constant 0 : index
    %3 = vector.load %arg2[%c0, %c0_1, %c0_2] : memref<8x8x16xbf16, #tpu.memory_space<vmem>>, vector<8x8x16xbf16>
    %4 = vector.shape_cast %3 : vector<8x8x16xbf16> to vector<64x16xbf16>
    %c0_3 = arith.constant 0 : index
    %c0_4 = arith.constant 0 : index
    %5 = vector.load %arg3[%c0_3, %c0_4] : memref<16x512xbf16, #tpu.memory_space<vmem>>, vector<16x512xbf16>
    %cst = arith.constant dense<0.000000e+00> : vector<64x512xf32>
    %6 = tpu.matmul %4, %5, %cst {dimension_numbers = #tpu.dot_dimension_numbers<[1], [0], [0], [1], [0, 0, 1, 1], [], []>} : vector<64x16xbf16>, vector<16x512xbf16>, vector<64x512xf32> -> vector<64x512xf32>
    %c0_5 = arith.constant 0 : index
    %c0_6 = arith.constant 0 : index
    %7 = vector.load %arg4[%c0_5, %c0_6] : memref<1x512xf32, #tpu.memory_space<vmem>>, vector<1x512xf32>
    %8 = vector.broadcast %7 : vector<1x512xf32> to vector<64x512xf32>
    %9 = arith.addf %6, %8 : vector<64x512xf32>
    %10 = vector.shape_cast %9 : vector<64x512xf32> to vector<8x8x512xf32>
    %c0_7 = arith.constant 0 : index
    %c0_8 = arith.constant 0 : index
    %c0_9 = arith.constant 0 : index
    %11 = vector.load %arg9[%c0_7, %c0_8, %c0_9] : memref<8x8x512xf32, #tpu.memory_space<vmem>>, vector<8x8x512xf32>
    tpu.vector_store %arg9[%c0_7, %c0_8, %c0_9], %10 {strides = array<i32>} : memref<8x8x512xf32, #tpu.memory_space<vmem>>, vector<8x8x512xf32>,
    %c0_10 = arith.constant 0 : index
    %c0_11 = arith.constant 0 : index
    %12 = vector.load %arg10[%c0_10, %c0_11] : memref<8x128xf32, #tpu.memory_space<vmem>>, vector<8x128xf32>
    %c0_12 = arith.constant 0 : index
    %c0_13 = arith.constant 0 : index
    %13 = vector.load %arg11[%c0_12, %c0_13] : memref<8x128xf32, #tpu.memory_space<vmem>>, vector<8x128xf32>
    %c0_i32_14 = arith.constant 0 : i32
    %14 = arith.index_cast %c0_i32_14 : i32 to index
    %c0_15 = arith.constant 0 : index
    %c0_16 = arith.constant 0 : index
    %15 = vector.load %arg9[%14, %c0_15, %c0_16] : memref<8x8x512xf32, #tpu.memory_space<vmem>>, vector<1x8x512xf32>
    %16 = vector.shape_cast %15 : vector<1x8x512xf32> to vector<8x512xf32>
    %17 = arith.truncf %12 : vector<8x128xf32> to vector<8x128xbf16>
    %c0_17 = arith.constant 0 : index
    %c0_18 = arith.constant 0 : index
    %18 = vector.load %arg5[%c0_17, %c0_18] : memref<128x512xbf16, #tpu.memory_space<vmem>>, vector<128x512xbf16>
    %cst_19 = arith.constant dense<0.000000e+00> : vector<8x512xf32>
    %19 = tpu.matmul %17, %18, %cst_19 {dimension_numbers = #tpu.dot_dimension_numbers<[1], [0], [0], [1], [0, 0, 1, 1], [], []>} : vector<8x128xbf16>, vector<128x512xbf16>, vector<8x512xf32> -> vector<8x512xf32>
    %20 = arith.addf %16, %19 : vector<8x512xf32>
    %21 = vector.extract_strided_slice %20 {offsets = [0, 0], sizes = [8, 384], strides = [1, 1]} : vector<8x512xf32> to vector<8x384xf32>
    %22 = arith.negf %21 : vector<8x384xf32>
    %23 = math.exp %22 : vector<8x384xf32>
    %cst_20 = arith.constant 1.000000e+00 : f32
    %24 = vector.broadcast %cst_20 : f32 to vector<8x384xf32>
    %25 = arith.addf %24, %23 : vector<8x384xf32>
    %26 = arith.divf %24, %25 : vector<8x384xf32>
    %27 = vector.extract_strided_slice %26 {offsets = [0, 0], sizes = [8, 128], strides = [1, 1]} : vector<8x384xf32> to vector<8x128xf32>
    %28 = vector.extract_strided_slice %26 {offsets = [0, 128], sizes = [8, 128], strides = [1, 1]} : vector<8x384xf32> to vector<8x128xf32>
    %29 = vector.extract_strided_slice %26 {offsets = [0, 256], sizes = [8, 128], strides = [1, 1]} : vector<8x384xf32> to vector<8x128xf32>
    %30 = vector.extract_strided_slice %20 {offsets = [0, 384], sizes = [8, 128], strides = [1, 1]} : vector<8x512xf32> to vector<8x128xf32>
    %31 = math.tanh %30 : vector<8x128xf32>
    %32 = arith.mulf %28, %13 : vector<8x128xf32>
    %33 = arith.mulf %27, %31 : vector<8x128xf32>
    %34 = arith.addf %32, %33 : vector<8x128xf32>
    %35 = math.tanh %34 : vector<8x128xf32>
    %36 = arith.mulf %29, %35 : vector<8x128xf32>
    %c1_i32 = arith.constant 1 : i32
    %37 = arith.index_cast %c1_i32 : i32 to index
    %c0_21 = arith.constant 0 : index
    %c0_22 = arith.constant 0 : index
    %38 = vector.load %arg9[%37, %c0_21, %c0_22] : memref<8x8x512xf32, #tpu.memory_space<vmem>>, vector<1x8x512xf32>
    %39 = vector.shape_cast %38 : vector<1x8x512xf32> to vector<8x512xf32>
    %40 = arith.truncf %36 : vector<8x128xf32> to vector<8x128xbf16>
    %c0_23 = arith.constant 0 : index
    %c0_24 = arith.constant 0 : index
    %41 = vector.load %arg5[%c0_23, %c0_24] : memref<128x512xbf16, #tpu.memory_space<vmem>>, vector<128x512xbf16>
    %cst_25 = arith.constant dense<0.000000e+00> : vector<8x512xf32>
    %42 = tpu.matmul %40, %41, %cst_25 {dimension_numbers = #tpu.dot_dimension_numbers<[1], [0], [0], [1], [0, 0, 1, 1], [], []>} : vector<8x128xbf16>, vector<128x512xbf16>, vector<8x512xf32> -> vector<8x512xf32>
    %43 = arith.addf %39, %42 : vector<8x512xf32>
    %44 = vector.extract_strided_slice %43 {offsets = [0, 0], sizes = [8, 384], strides = [1, 1]} : vector<8x512xf32> to vector<8x384xf32>
    %45 = arith.negf %44 : vector<8x384xf32>
    %46 = math.exp %45 : vector<8x384xf32>
    %cst_26 = arith.constant 1.000000e+00 : f32
    %47 = vector.broadcast %cst_26 : f32 to vector<8x384xf32>
    %48 = arith.addf %47, %46 : vector<8x384xf32>
    %49 = arith.divf %47, %48 : vector<8x384xf32>
    %50 = vector.extract_strided_slice %49 {offsets = [0, 0], sizes = [8, 128], strides = [1, 1]} : vector<8x384xf32> to vector<8x128xf32>
    %51 = vector.extract_strided_slice %49 {offsets = [0, 128], sizes = [8, 128], strides = [1, 1]} : vector<8x384xf32> to vector<8x128xf32>
    %52 = vector.extract_strided_slice %49 {offsets = [0, 256], sizes = [8, 128], strides = [1, 1]} : vector<8x384xf32> to vector<8x128xf32>
    %53 = vector.extract_strided_slice %43 {offsets = [0, 384], sizes = [8, 128], strides = [1, 1]} : vector<8x512xf32> to vector<8x128xf32>
    %54 = math.tanh %53 : vector<8x128xf32>
    %55 = arith.mulf %51, %34 : vector<8x128xf32>
    %56 = arith.mulf %50, %54 : vector<8x128xf32>
    %57 = arith.addf %55, %56 : vector<8x128xf32>
    %58 = math.tanh %57 : vector<8x128xf32>
    %59 = arith.mulf %52, %58 : vector<8x128xf32>
    %c2_i32 = arith.constant 2 : i32
    %60 = arith.index_cast %c2_i32 : i32 to index
    %c0_27 = arith.constant 0 : index
    %c0_28 = arith.constant 0 : index
    %61 = vector.load %arg9[%60, %c0_27, %c0_28] : memref<8x8x512xf32, #tpu.memory_space<vmem>>, vector<1x8x512xf32>
    %62 = vector.shape_cast %61 : vector<1x8x512xf32> to vector<8x512xf32>
    %63 = arith.truncf %59 : vector<8x128xf32> to vector<8x128xbf16>
    %c0_29 = arith.constant 0 : index
    %c0_30 = arith.constant 0 : index
    %64 = vector.load %arg5[%c0_29, %c0_30] : memref<128x512xbf16, #tpu.memory_space<vmem>>, vector<128x512xbf16>
    %cst_31 = arith.constant dense<0.000000e+00> : vector<8x512xf32>
    %65 = tpu.matmul %63, %64, %cst_31 {dimension_numbers = #tpu.dot_dimension_numbers<[1], [0], [0], [1], [0, 0, 1, 1], [], []>} : vector<8x128xbf16>, vector<128x512xbf16>, vector<8x512xf32> -> vector<8x512xf32>
    %66 = arith.addf %62, %65 : vector<8x512xf32>
    %67 = vector.extract_strided_slice %66 {offsets = [0, 0], sizes = [8, 384], strides = [1, 1]} : vector<8x512xf32> to vector<8x384xf32>
    %68 = arith.negf %67 : vector<8x384xf32>
    %69 = math.exp %68 : vector<8x384xf32>
    %cst_32 = arith.constant 1.000000e+00 : f32
    %70 = vector.broadcast %cst_32 : f32 to vector<8x384xf32>
    %71 = arith.addf %70, %69 : vector<8x384xf32>
    %72 = arith.divf %70, %71 : vector<8x384xf32>
    %73 = vector.extract_strided_slice %72 {offsets = [0, 0], sizes = [8, 128], strides = [1, 1]} : vector<8x384xf32> to vector<8x128xf32>
    %74 = vector.extract_strided_slice %72 {offsets = [0, 128], sizes = [8, 128], strides = [1, 1]} : vector<8x384xf32> to vector<8x128xf32>
    %75 = vector.extract_strided_slice %72 {offsets = [0, 256], sizes = [8, 128], strides = [1, 1]} : vector<8x384xf32> to vector<8x128xf32>
    %76 = vector.extract_strided_slice %66 {offsets = [0, 384], sizes = [8, 128], strides = [1, 1]} : vector<8x512xf32> to vector<8x128xf32>
    %77 = math.tanh %76 : vector<8x128xf32>
    %78 = arith.mulf %74, %57 : vector<8x128xf32>
    %79 = arith.mulf %73, %77 : vector<8x128xf32>
    %80 = arith.addf %78, %79 : vector<8x128xf32>
    %81 = math.tanh %80 : vector<8x128xf32>
    %82 = arith.mulf %75, %81 : vector<8x128xf32>
    %c3_i32 = arith.constant 3 : i32
    %83 = arith.index_cast %c3_i32 : i32 to index
    %c0_33 = arith.constant 0 : index
    %c0_34 = arith.constant 0 : index
    %84 = vector.load %arg9[%83, %c0_33, %c0_34] : memref<8x8x512xf32, #tpu.memory_space<vmem>>, vector<1x8x512xf32>
    %85 = vector.shape_cast %84 : vector<1x8x512xf32> to vector<8x512xf32>
    %86 = arith.truncf %82 : vector<8x128xf32> to vector<8x128xbf16>
    %c0_35 = arith.constant 0 : index
    %c0_36 = arith.constant 0 : index
    %87 = vector.load %arg5[%c0_35, %c0_36] : memref<128x512xbf16, #tpu.memory_space<vmem>>, vector<128x512xbf16>
    %cst_37 = arith.constant dense<0.000000e+00> : vector<8x512xf32>
    %88 = tpu.matmul %86, %87, %cst_37 {dimension_numbers = #tpu.dot_dimension_numbers<[1], [0], [0], [1], [0, 0, 1, 1], [], []>} : vector<8x128xbf16>, vector<128x512xbf16>, vector<8x512xf32> -> vector<8x512xf32>
    %89 = arith.addf %85, %88 : vector<8x512xf32>
    %90 = vector.extract_strided_slice %89 {offsets = [0, 0], sizes = [8, 384], strides = [1, 1]} : vector<8x512xf32> to vector<8x384xf32>
    %91 = arith.negf %90 : vector<8x384xf32>
    %92 = math.exp %91 : vector<8x384xf32>
    %cst_38 = arith.constant 1.000000e+00 : f32
    %93 = vector.broadcast %cst_38 : f32 to vector<8x384xf32>
    %94 = arith.addf %93, %92 : vector<8x384xf32>
    %95 = arith.divf %93, %94 : vector<8x384xf32>
    %96 = vector.extract_strided_slice %95 {offsets = [0, 0], sizes = [8, 128], strides = [1, 1]} : vector<8x384xf32> to vector<8x128xf32>
    %97 = vector.extract_strided_slice %95 {offsets = [0, 128], sizes = [8, 128], strides = [1, 1]} : vector<8x384xf32> to vector<8x128xf32>
    %98 = vector.extract_strided_slice %95 {offsets = [0, 256], sizes = [8, 128], strides = [1, 1]} : vector<8x384xf32> to vector<8x128xf32>
    %99 = vector.extract_strided_slice %89 {offsets = [0, 384], sizes = [8, 128], strides = [1, 1]} : vector<8x512xf32> to vector<8x128xf32>
    %100 = math.tanh %99 : vector<8x128xf32>
    %101 = arith.mulf %97, %80 : vector<8x128xf32>
    %102 = arith.mulf %96, %100 : vector<8x128xf32>
    %103 = arith.addf %101, %102 : vector<8x128xf32>
    %104 = math.tanh %103 : vector<8x128xf32>
    %105 = arith.mulf %98, %104 : vector<8x128xf32>
    %c4_i32 = arith.constant 4 : i32
    %106 = arith.index_cast %c4_i32 : i32 to index
    %c0_39 = arith.constant 0 : index
    %c0_40 = arith.constant 0 : index
    %107 = vector.load %arg9[%106, %c0_39, %c0_40] : memref<8x8x512xf32, #tpu.memory_space<vmem>>, vector<1x8x512xf32>
    %108 = vector.shape_cast %107 : vector<1x8x512xf32> to vector<8x512xf32>
    %109 = arith.truncf %105 : vector<8x128xf32> to vector<8x128xbf16>
    %c0_41 = arith.constant 0 : index
    %c0_42 = arith.constant 0 : index
    %110 = vector.load %arg5[%c0_41, %c0_42] : memref<128x512xbf16, #tpu.memory_space<vmem>>, vector<128x512xbf16>
    %cst_43 = arith.constant dense<0.000000e+00> : vector<8x512xf32>
    %111 = tpu.matmul %109, %110, %cst_43 {dimension_numbers = #tpu.dot_dimension_numbers<[1], [0], [0], [1], [0, 0, 1, 1], [], []>} : vector<8x128xbf16>, vector<128x512xbf16>, vector<8x512xf32> -> vector<8x512xf32>
    %112 = arith.addf %108, %111 : vector<8x512xf32>
    %113 = vector.extract_strided_slice %112 {offsets = [0, 0], sizes = [8, 384], strides = [1, 1]} : vector<8x512xf32> to vector<8x384xf32>
    %114 = arith.negf %113 : vector<8x384xf32>
    %115 = math.exp %114 : vector<8x384xf32>
    %cst_44 = arith.constant 1.000000e+00 : f32
    %116 = vector.broadcast %cst_44 : f32 to vector<8x384xf32>
    %117 = arith.addf %116, %115 : vector<8x384xf32>
    %118 = arith.divf %116, %117 : vector<8x384xf32>
    %119 = vector.extract_strided_slice %118 {offsets = [0, 0], sizes = [8, 128], strides = [1, 1]} : vector<8x384xf32> to vector<8x128xf32>
    %120 = vector.extract_strided_slice %118 {offsets = [0, 128], sizes = [8, 128], strides = [1, 1]} : vector<8x384xf32> to vector<8x128xf32>
    %121 = vector.extract_strided_slice %118 {offsets = [0, 256], sizes = [8, 128], strides = [1, 1]} : vector<8x384xf32> to vector<8x128xf32>
    %122 = vector.extract_strided_slice %112 {offsets = [0, 384], sizes = [8, 128], strides = [1, 1]} : vector<8x512xf32> to vector<8x128xf32>
    %123 = math.tanh %122 : vector<8x128xf32>
    %124 = arith.mulf %120, %103 : vector<8x128xf32>
    %125 = arith.mulf %119, %123 : vector<8x128xf32>
    %126 = arith.addf %124, %125 : vector<8x128xf32>
    %127 = math.tanh %126 : vector<8x128xf32>
    %128 = arith.mulf %121, %127 : vector<8x128xf32>
    %c5_i32 = arith.constant 5 : i32
    %129 = arith.index_cast %c5_i32 : i32 to index
    %c0_45 = arith.constant 0 : index
    %c0_46 = arith.constant 0 : index
    %130 = vector.load %arg9[%129, %c0_45, %c0_46] : memref<8x8x512xf32, #tpu.memory_space<vmem>>, vector<1x8x512xf32>
    %131 = vector.shape_cast %130 : vector<1x8x512xf32> to vector<8x512xf32>
    %132 = arith.truncf %128 : vector<8x128xf32> to vector<8x128xbf16>
    %c0_47 = arith.constant 0 : index
    %c0_48 = arith.constant 0 : index
    %133 = vector.load %arg5[%c0_47, %c0_48] : memref<128x512xbf16, #tpu.memory_space<vmem>>, vector<128x512xbf16>
    %cst_49 = arith.constant dense<0.000000e+00> : vector<8x512xf32>
    %134 = tpu.matmul %132, %133, %cst_49 {dimension_numbers = #tpu.dot_dimension_numbers<[1], [0], [0], [1], [0, 0, 1, 1], [], []>} : vector<8x128xbf16>, vector<128x512xbf16>, vector<8x512xf32> -> vector<8x512xf32>
    %135 = arith.addf %131, %134 : vector<8x512xf32>
    %136 = vector.extract_strided_slice %135 {offsets = [0, 0], sizes = [8, 384], strides = [1, 1]} : vector<8x512xf32> to vector<8x384xf32>
    %137 = arith.negf %136 : vector<8x384xf32>
    %138 = math.exp %137 : vector<8x384xf32>
    %cst_50 = arith.constant 1.000000e+00 : f32
    %139 = vector.broadcast %cst_50 : f32 to vector<8x384xf32>
    %140 = arith.addf %139, %138 : vector<8x384xf32>
    %141 = arith.divf %139, %140 : vector<8x384xf32>
    %142 = vector.extract_strided_slice %141 {offsets = [0, 0], sizes = [8, 128], strides = [1, 1]} : vector<8x384xf32> to vector<8x128xf32>
    %143 = vector.extract_strided_slice %141 {offsets = [0, 128], sizes = [8, 128], strides = [1, 1]} : vector<8x384xf32> to vector<8x128xf32>
    %144 = vector.extract_strided_slice %141 {offsets = [0, 256], sizes = [8, 128], strides = [1, 1]} : vector<8x384xf32> to vector<8x128xf32>
    %145 = vector.extract_strided_slice %135 {offsets = [0, 384], sizes = [8, 128], strides = [1, 1]} : vector<8x512xf32> to vector<8x128xf32>
    %146 = math.tanh %145 : vector<8x128xf32>
    %147 = arith.mulf %143, %126 : vector<8x128xf32>
    %148 = arith.mulf %142, %146 : vector<8x128xf32>
    %149 = arith.addf %147, %148 : vector<8x128xf32>
    %150 = math.tanh %149 : vector<8x128xf32>
    %151 = arith.mulf %144, %150 : vector<8x128xf32>
    %c6_i32 = arith.constant 6 : i32
    %152 = arith.index_cast %c6_i32 : i32 to index
    %c0_51 = arith.constant 0 : index
    %c0_52 = arith.constant 0 : index
    %153 = vector.load %arg9[%152, %c0_51, %c0_52] : memref<8x8x512xf32, #tpu.memory_space<vmem>>, vector<1x8x512xf32>
    %154 = vector.shape_cast %153 : vector<1x8x512xf32> to vector<8x512xf32>
    %155 = arith.truncf %151 : vector<8x128xf32> to vector<8x128xbf16>
    %c0_53 = arith.constant 0 : index
    %c0_54 = arith.constant 0 : index
    %156 = vector.load %arg5[%c0_53, %c0_54] : memref<128x512xbf16, #tpu.memory_space<vmem>>, vector<128x512xbf16>
    %cst_55 = arith.constant dense<0.000000e+00> : vector<8x512xf32>
    %157 = tpu.matmul %155, %156, %cst_55 {dimension_numbers = #tpu.dot_dimension_numbers<[1], [0], [0], [1], [0, 0, 1, 1], [], []>} : vector<8x128xbf16>, vector<128x512xbf16>, vector<8x512xf32> -> vector<8x512xf32>
    %158 = arith.addf %154, %157 : vector<8x512xf32>
    %159 = vector.extract_strided_slice %158 {offsets = [0, 0], sizes = [8, 384], strides = [1, 1]} : vector<8x512xf32> to vector<8x384xf32>
    %160 = arith.negf %159 : vector<8x384xf32>
    %161 = math.exp %160 : vector<8x384xf32>
    %cst_56 = arith.constant 1.000000e+00 : f32
    %162 = vector.broadcast %cst_56 : f32 to vector<8x384xf32>
    %163 = arith.addf %162, %161 : vector<8x384xf32>
    %164 = arith.divf %162, %163 : vector<8x384xf32>
    %165 = vector.extract_strided_slice %164 {offsets = [0, 0], sizes = [8, 128], strides = [1, 1]} : vector<8x384xf32> to vector<8x128xf32>
    %166 = vector.extract_strided_slice %164 {offsets = [0, 128], sizes = [8, 128], strides = [1, 1]} : vector<8x384xf32> to vector<8x128xf32>
    %167 = vector.extract_strided_slice %164 {offsets = [0, 256], sizes = [8, 128], strides = [1, 1]} : vector<8x384xf32> to vector<8x128xf32>
    %168 = vector.extract_strided_slice %158 {offsets = [0, 384], sizes = [8, 128], strides = [1, 1]} : vector<8x512xf32> to vector<8x128xf32>
    %169 = math.tanh %168 : vector<8x128xf32>
    %170 = arith.mulf %166, %149 : vector<8x128xf32>
    %171 = arith.mulf %165, %169 : vector<8x128xf32>
    %172 = arith.addf %170, %171 : vector<8x128xf32>
    %173 = math.tanh %172 : vector<8x128xf32>
    %174 = arith.mulf %167, %173 : vector<8x128xf32>
    %c7_i32 = arith.constant 7 : i32
    %175 = arith.index_cast %c7_i32 : i32 to index
    %c0_57 = arith.constant 0 : index
    %c0_58 = arith.constant 0 : index
    %176 = vector.load %arg9[%175, %c0_57, %c0_58] : memref<8x8x512xf32, #tpu.memory_space<vmem>>, vector<1x8x512xf32>
    %177 = vector.shape_cast %176 : vector<1x8x512xf32> to vector<8x512xf32>
    %178 = arith.truncf %174 : vector<8x128xf32> to vector<8x128xbf16>
    %c0_59 = arith.constant 0 : index
    %c0_60 = arith.constant 0 : index
    %179 = vector.load %arg5[%c0_59, %c0_60] : memref<128x512xbf16, #tpu.memory_space<vmem>>, vector<128x512xbf16>
    %cst_61 = arith.constant dense<0.000000e+00> : vector<8x512xf32>
    %180 = tpu.matmul %178, %179, %cst_61 {dimension_numbers = #tpu.dot_dimension_numbers<[1], [0], [0], [1], [0, 0, 1, 1], [], []>} : vector<8x128xbf16>, vector<128x512xbf16>, vector<8x512xf32> -> vector<8x512xf32>
    %181 = arith.addf %177, %180 : vector<8x512xf32>
    %182 = vector.extract_strided_slice %181 {offsets = [0, 0], sizes = [8, 384], strides = [1, 1]} : vector<8x512xf32> to vector<8x384xf32>
    %183 = arith.negf %182 : vector<8x384xf32>
    %184 = math.exp %183 : vector<8x384xf32>
    %cst_62 = arith.constant 1.000000e+00 : f32
    %185 = vector.broadcast %cst_62 : f32 to vector<8x384xf32>
    %186 = arith.addf %185, %184 : vector<8x384xf32>
    %187 = arith.divf %185, %186 : vector<8x384xf32>
    %188 = vector.extract_strided_slice %187 {offsets = [0, 0], sizes = [8, 128], strides = [1, 1]} : vector<8x384xf32> to vector<8x128xf32>
    %189 = vector.extract_strided_slice %187 {offsets = [0, 128], sizes = [8, 128], strides = [1, 1]} : vector<8x384xf32> to vector<8x128xf32>
    %190 = vector.extract_strided_slice %187 {offsets = [0, 256], sizes = [8, 128], strides = [1, 1]} : vector<8x384xf32> to vector<8x128xf32>
    %191 = vector.extract_strided_slice %181 {offsets = [0, 384], sizes = [8, 128], strides = [1, 1]} : vector<8x512xf32> to vector<8x128xf32>
    %192 = math.tanh %191 : vector<8x128xf32>
    %193 = arith.mulf %189, %172 : vector<8x128xf32>
    %194 = arith.mulf %188, %192 : vector<8x128xf32>
    %195 = arith.addf %193, %194 : vector<8x128xf32>
    %196 = math.tanh %195 : vector<8x128xf32>
    %197 = arith.mulf %190, %196 : vector<8x128xf32>
    %c8_i32 = arith.constant 8 : i32
    %c0_63 = arith.constant 0 : index
    %c0_64 = arith.constant 0 : index
    %198 = vector.load %arg10[%c0_63, %c0_64] : memref<8x128xf32, #tpu.memory_space<vmem>>, vector<8x128xf32>
    tpu.vector_store %arg10[%c0_63, %c0_64], %197 {strides = array<i32>} : memref<8x128xf32, #tpu.memory_space<vmem>>, vector<8x128xf32>,
    %c0_65 = arith.constant 0 : index
    %c0_66 = arith.constant 0 : index
    %199 = vector.load %arg11[%c0_65, %c0_66] : memref<8x128xf32, #tpu.memory_space<vmem>>, vector<8x128xf32>
    tpu.vector_store %arg11[%c0_65, %c0_66], %195 {strides = array<i32>} : memref<8x128xf32, #tpu.memory_space<vmem>>, vector<8x128xf32>,
    %c0_i32_67 = arith.constant 0 : i32
    %200 = arith.cmpi eq, %arg1, %c0_i32_67 : i32
    %201 = arith.extui %200 : i1 to i32
    %c0_i32_68 = arith.constant 0 : i32
    %202 = arith.cmpi ne, %201, %c0_i32_68 : i32
    scf.if %202 {
      %c0_69 = arith.constant 0 : index
      %c0_70 = arith.constant 0 : index
      %203 = vector.load %arg10[%c0_69, %c0_70] : memref<8x128xf32, #tpu.memory_space<vmem>>, vector<8x128xf32>
      %204 = arith.truncf %203 : vector<8x128xf32> to vector<8x128xbf16>
      %c0_71 = arith.constant 0 : index
      %c0_72 = arith.constant 0 : index
      %205 = vector.load %arg6[%c0_71, %c0_72] : memref<128x128xbf16, #tpu.memory_space<vmem>>, vector<128x128xbf16>
      %cst_73 = arith.constant dense<0.000000e+00> : vector<8x128xf32>
      %206 = tpu.matmul %204, %205, %cst_73 {dimension_numbers = #tpu.dot_dimension_numbers<[1], [0], [0], [1], [0, 0, 1, 1], [], []>} : vector<8x128xbf16>, vector<128x128xbf16>, vector<8x128xf32> -> vector<8x128xf32>
      %c0_74 = arith.constant 0 : index
      %c0_75 = arith.constant 0 : index
      %207 = vector.load %arg7[%c0_74, %c0_75] : memref<1x128xf32, #tpu.memory_space<vmem>>, vector<1x128xf32>
      %208 = vector.broadcast %207 : vector<1x128xf32> to vector<8x128xf32>
      %209 = arith.addf %206, %208 : vector<8x128xf32>
      %c0_76 = arith.constant 0 : index
      %c0_77 = arith.constant 0 : index
      %210 = vector.load %arg8[%c0_76, %c0_77] : memref<8x128xf32, #tpu.memory_space<vmem>>, vector<8x128xf32>
      tpu.vector_store %arg8[%c0_76, %c0_77], %209 {strides = array<i32>} : memref<8x128xf32, #tpu.memory_space<vmem>>, vector<8x128xf32>,
    } else {
    }
    return
  }
  func.func @transform_0(%arg0: i32, %arg1: i32) -> (i32, i32, i32) {
    %c0_i32 = arith.constant 0 : i32
    %c0_i32_0 = arith.constant 0 : i32
    return %arg1, %arg0, %c0_i32 : i32, i32, i32
  }
  func.func @transform_1(%arg0: i32, %arg1: i32) -> (i32, i32) {
    %c0_i32 = arith.constant 0 : i32
    %c0_i32_0 = arith.constant 0 : i32
    %c0_i32_1 = arith.constant 0 : i32
    return %c0_i32, %c0_i32_0 : i32, i32
  }
  func.func @transform_2(%arg0: i32, %arg1: i32) -> (i32, i32) {
    %c0_i32 = arith.constant 0 : i32
    %c0_i32_0 = arith.constant 0 : i32
    %c0_i32_1 = arith.constant 0 : i32
    return %c0_i32, %c0_i32_0 : i32, i32
  }
  func.func @transform_3(%arg0: i32, %arg1: i32) -> (i32, i32) {
    %c0_i32 = arith.constant 0 : i32
    %c0_i32_0 = arith.constant 0 : i32
    %c0_i32_1 = arith.constant 0 : i32
    return %c0_i32, %c0_i32_0 : i32, i32
  }
  func.func @transform_4(%arg0: i32, %arg1: i32) -> (i32, i32) {
    %c0_i32 = arith.constant 0 : i32
    %c0_i32_0 = arith.constant 0 : i32
    %c0_i32_1 = arith.constant 0 : i32
    return %c0_i32, %c0_i32_0 : i32, i32
  }
  func.func @transform_5(%arg0: i32, %arg1: i32) -> (i32, i32) {
    %c0_i32 = arith.constant 0 : i32
    %c0_i32_0 = arith.constant 0 : i32
    %c0_i32_1 = arith.constant 0 : i32
    return %c0_i32, %c0_i32_0 : i32, i32
  }
  func.func @transform_6(%arg0: i32, %arg1: i32) -> (i32, i32) {
    %c0_i32 = arith.constant 0 : i32
    %c0_i32_0 = arith.constant 0 : i32
    return %arg0, %c0_i32 : i32, i32
  }
}

</mosaic_0001>

<bundles_post_ra>
// kernel: tpu_custom_call.1
= control target key start
LH: loop header
LB: loop body
LE: loop exit
PB: predicated region body
PF: predicated region fallthrough
CT: control target
= control target key end

     0   :  { %11 = vsyncpa [#allocation6], 0  ;;  %s2786_s0 = inlined_call_operand.hbm [shape: bf16[8,8,16], index: 0, kind: input, shape index: {}]   ;;  %s2787_s1 = inlined_call_operand.hbm [shape: bf16[16,512], index: 1, kind: input, shape index: {}]   ;;  %s2788_s2 = inlined_call_operand.hbm [shape: f32[1,512], index: 2, kind: input, shape index: {}]   ;;  %s2789_s3 = inlined_call_operand.hbm [shape: bf16[128,512], index: 3, kind: input, shape index: {}]   ;;  %s2790_s4 = inlined_call_operand.hbm [shape: bf16[128,128], index: 4, kind: input, shape index: {}]   ;;  %s2791_s5 = inlined_call_operand.vmem [shape: f32[1,128], index: 5, kind: input, shape index: {}]   ;;  %s2792_s6 = inlined_call_operand.hbm [shape: f32[8,128], index: 6, kind: output, shape index: {}]  }
   0x1   :  { %12 = vsyncpa [#allocation9], 0 }
   0x2   :  { %13 = vsyncpa [#allocation12], 0  ;;  %s32_s23 = sshll.u32 %s2787_s1, 4  ;;  %s33_s23 = int_to_ptr.hbm [resolvable:$true] %s32_s23 }
   0x3   :  { %14 = vsyncpa [#allocation7], 0  ;;  %s2204_s24 = smov [#allocation8]   ;;  %s56_s28 = sshll.u32 %s2789_s3, 4  ;;  %s57_s28 = int_to_ptr.hbm [resolvable:$true] %s56_s28 }
   0x4   :  { %s34_s25 = sshll.u32 %s2204_s24, 4  ;;  %s2205_s29 = smov 256   ;;  %s35_s25 = int_to_ptr.vmem [resolvable:$true] %s34_s25 }
   0x5   :  { %s2206_s30 = smov 16   ;;  %s2207_s7 = smov [#allocation11]  }
   0x6   :  { %40 = dma.hbm_to_vmem [thread:$0]  %s33_s23, 512, %s35_s25, [#allocation9], %s2205_s29, %s2205_s29, %s2206_s30  }
   0x7   :  { %s58_s8 = sshll.u32 %s2207_s7, 4  ;;  %s19_s11 = sshll.u32 %s2786_s0, 4  ;;  %s59_s8 = int_to_ptr.vmem [resolvable:$true] %s58_s8  ;;  %s20_s11 = int_to_ptr.hbm [resolvable:$true] %s19_s11 }
   0x8   :  { %64 = dma.hbm_to_vmem [thread:$0]  %s57_s28, 4096, %s59_s8, [#allocation12], %s2205_s29, %s2205_s29, %s2206_s30  }
   0x9   :  { %s2208_s1 = smov [#allocation5]   ;;  %s46_s3 = sshll.u32 %s2788_s2, 4  ;;  %s47_s3 = int_to_ptr.hbm [resolvable:$true] %s46_s3 }
   0xa   :  { %s21_s12 = sshll.u32 %s2208_s1, 4  ;;  %s2209_s15 = smov 64   ;;  %s22_s12 = int_to_ptr.vmem [resolvable:$true] %s21_s12 }
   0xb   :  { %s2210_s16 = smov 4   ;;  %s2211_s17 = smov [#allocation10]  }
   0xc   :  { %27 = dma.hbm_to_vmem [thread:$0]  %s20_s11, 512, %s22_s12, [#allocation6], %s2209_s15, %s2209_s15, %s2210_s16  }
   0xd   :  { %s48_s18 = sshll.u32 %s2211_s17, 4  ;;  %s69_s0 = sshll.u32 %s2790_s4, 4  ;;  %s49_s18 = int_to_ptr.vmem [resolvable:$true] %s48_s18  ;;  %s70_s0 = int_to_ptr.hbm [resolvable:$true] %s69_s0 }
   0xe   :  { %51 = dma.hbm_to_vmem [thread:$0]  %s47_s3, 64, %s49_s18, [#allocation9]  }
   0xf   :  { %s2212_s21 = smov [#allocation13]  }
  0x10   :  { %s71_s22 = sshll.u32 %s2212_s21, 4  ;;  %s72_s22 = int_to_ptr.vmem [resolvable:$true] %s71_s22 }
  0x11   :  { %77 = dma.hbm_to_vmem [thread:$0]  %s70_s0, 1024, %s72_s22, [#allocation12], %s2209_s15, %s2209_s15, %s2210_s16  }
  0x12   :  { %2196 = dma.done.wait [#allocation6], 512  }
  0x13   :  { %2197 = vsyncadd [#allocation6], 4294966784 }
  0x14   :  { %2198 = dma.done.wait [#allocation9], 576  }
  0x15   :  { %2199 = vsyncadd [#allocation9], 4294966720 }
  0x16   :  { %2200 = dma.done.wait [#allocation12], 5120  }
  0x17   :  { %2201 = vsyncadd [#allocation12], 4294962176  ;;  %v1649_v0 = vld [vmem:[#allocation8] sm:$0xf]  ;;  %v1869_v1 = vld [vmem:[#allocation8 + $0xc] sm:$0xf0] }
  0x18   :  { %v1657_v2 = vld [vmem:[#allocation8 + $0x8] sm:$0xf]  ;;  %v1650_v3 = vor.u32 %v1869_v1, %v1649_v0  ;;  %v1870_v4 = vld [vmem:[#allocation8 + $0x14] sm:$0xf0]  ;;  %v1868_v5 = vld [vmem:[#allocation8 + $0xc] sm:$0xf] }
  0x19   :  { %v1659_v6 = vld [vmem:[#allocation8 + $0x18] sm:$0xf0]  ;;  %v1658_v7 = vor.u32 %v1870_v4, %v1657_v2  ;;  %v2265_v9 = vld [vmem:[#allocation5] sm:$0xff]  ;;  %vm169_vm0 = vcmask 130048   ;;  %v1651_v12 = vld [vmem:[#allocation8 + $0x10] sm:$0xf0] }
  0x1a   :  { %v1662_v8 = vor.u32 %v1868_v5, %v1659_v6  ;;  %v2267_v10 = vld [vmem:[#allocation5 + $0x18] sm:$0xff]  ;;  %v1867_v11 = vld [vmem:[#allocation8 + $0x4] sm:$0xf]  ;;  %189 = vmatpush.bf16.msra.mxu0 %v1650_v3  ;;  %1911 = vmatpush.bf16.msra.mxu1 %v1650_v3  ;;  %v1899_v13 = vld [vmem:[#allocation11 + $0xe4] sm:$0xf]  ;;  %s2214_s23 = smov [#allocation14]  }
  0x1b   :  { %247 = vmatpush.bf16.msra.mxu2 %v1658_v7  ;;  %v1654_v14 = vor.u32 %v1867_v11, %v1651_v12  ;;  %v1795_v15 = vld [vmem:[#allocation11 + $0xf0] sm:$0xf0]  ;;  %v1793_v16 = vld [vmem:[#allocation11 + $0xe0] sm:$0xf]  ;;  %v1901_v17 = vld [vmem:[#allocation11 + $0xec] sm:$0xf0] }
  0x1c   :  { %276 = vmatpush.bf16.msra.mxu3 %v1662_v8  ;;  %v2269_v18 = vor.u32 %v1899_v13, %v1795_v15  ;;  %v2271_v19 = vor.u32 %v1901_v17, %v1793_v16  ;;  %v1777_v20 = vld [vmem:[#allocation11 + $0xc0] sm:$0xf]  ;;  %v1897_v21 = vld [vmem:[#allocation11 + $0xcc] sm:$0xf0]  ;;  %v1801_v22 = vld [vmem:[#allocation11 + $0xe8] sm:$0xf] }
  0x1d   :  { %1663 = vmatmul.msk.bf16.vlgmr.msra.gmra.mxu0 %vm169_vm0, %v2265_v9  ;;  %1666 = vmatmul.msk.bf16.vlgmr.msra.gmra.mxu1 %vm169_vm0, %v2267_v10  ;;  %v1902_v23 = vld [vmem:[#allocation11 + $0xf4] sm:$0xf0]  ;;  %v1895_v24 = vld [vmem:[#allocation11 + $0xc4] sm:$0xf]  ;;  %v1779_v25 = vld [vmem:[#allocation11 + $0xd0] sm:$0xf0]  ;;  %v2287_v30 = vor.u32 %v1897_v21, %v1777_v20 }
  0x1e   :  { %218 = vmatpush.bf16.msrb.mxu1 %v1654_v14  ;;  %1671 = vmatmul.msk.bf16.vlgmr.msra.gmra.mxu2 %vm169_vm0, %v2265_v9  ;;  %v2279_v26 = vor.u32 %v1902_v23, %v1801_v22  ;;  %v2284_v27 = vor.u32 %v1895_v24, %v1779_v25  ;;  %v1785_v28 = vld [vmem:[#allocation11 + $0xc8] sm:$0xf]  ;;  %v1898_v29 = vld [vmem:[#allocation11 + $0xd4] sm:$0xf0]  ;;  %v1761_v31 = vld [vmem:[#allocation11 + $0xa0] sm:$0xf] }
  0x1f   :  { %1675 = vmatmul.msk.bf16.vlgmr.msra.gmra.mxu3 %vm169_vm0, %v2265_v9  ;;  %529 = vmatpush.bf16.msrb.mxu0 %v2271_v19  ;;  %v2290_v32 = vor.u32 %v1898_v29, %v1785_v28  ;;  %v1900_v33 = vld [vmem:[#allocation11 + $0xec] sm:$0xf]  ;;  %v1803_v34 = vld [vmem:[#allocation11 + $0xf8] sm:$0xf0]  ;;  %v1893_v35 = vld [vmem:[#allocation11 + $0xac] sm:$0xf0] }
  0x20   :  { %555 = vmatpush.bf16.msrb.mxu2 %v2279_v26  ;;  %v2292_v36 = vor.u32 %v1900_v33, %v1803_v34  ;;  %v1891_v37 = vld [vmem:[#allocation11 + $0xa4] sm:$0xf]  ;;  %v1763_v38 = vld [vmem:[#allocation11 + $0xb0] sm:$0xf0]  ;;  %v1769_v40 = vld [vmem:[#allocation11 + $0xa8] sm:$0xf]  ;;  %v2299_v43 = vor.u32 %v1893_v35, %v1761_v31 }
  0x21   :  { %v2296_v39 = vor.u32 %v1891_v37, %v1763_v38  ;;  %v1894_v41 = vld [vmem:[#allocation11 + $0xb4] sm:$0xf0]  ;;  %v1896_v42 = vld [vmem:[#allocation11 + $0xcc] sm:$0xf]  ;;  %v1787_v45 = vld [vmem:[#allocation11 + $0xd8] sm:$0xf0] }
  0x22   :  { %542 = vmatpush.bf16.msra.mxu1 %v2269_v18  ;;  %568 = vmatpush.bf16.msrb.mxu3 %v2292_v36  ;;  %v2302_v44 = vor.u32 %v1894_v41, %v1769_v40  ;;  %v1887_v46 = vld [vmem:[#allocation11 + $0x84] sm:$0xf]  ;;  %v1747_v47 = vld [vmem:[#allocation11 + $0x90] sm:$0xf0]  ;;  %v1745_v48 = vld [vmem:[#allocation11 + $0x80] sm:$0xf]  ;;  %v2304_v50 = vor.u32 %v1896_v42, %v1787_v45 }
  0x23   :  { %530 = vmatpush.bf16.msrb.mxu0 %v2287_v30  ;;  %v1889_v49 = vld [vmem:[#allocation11 + $0x8c] sm:$0xf0]  ;;  %v1892_v51 = vld [vmem:[#allocation11 + $0xac] sm:$0xf]  ;;  %v1771_v52 = vld [vmem:[#allocation11 + $0xb8] sm:$0xf0]  ;;  %v2308_v53 = vor.u32 %v1887_v46, %v1747_v47 }
  0x24   :  { %556 = vmatpush.bf16.msrb.mxu2 %v2290_v32  ;;  %v2310_v54 = vor.u32 %v1892_v51, %v1771_v52  ;;  %v1753_v55 = vld [vmem:[#allocation11 + $0x88] sm:$0xf]  ;;  %v1890_v56 = vld [vmem:[#allocation11 + $0x94] sm:$0xf0]  ;;  %v2315_v58 = vor.u32 %v1889_v49, %v1745_v48  ;;  %v1729_v59 = vld [vmem:[#allocation11 + $0x60] sm:$0xf] }
  0x25   :  { %v2312_v57 = vld [vmem:[#allocation5 + $0x8] sm:$0xff]  ;;  %v2318_v60 = vor.u32 %v1890_v56, %v1753_v55  ;;  %v1885_v61 = vld [vmem:[#allocation11 + $0x6c] sm:$0xf0]  ;;  %v1888_v62 = vld [vmem:[#allocation11 + $0x8c] sm:$0xf]  ;;  %s1617_s24 = sshll.u32 %s2214_s23, 4  ;;  %s1618_s24 = int_to_ptr.vmem [resolvable:$true] %s1617_s24 }
  0x26   :  { %543 = vmatpush.bf16.msra.mxu1 %v2284_v27  ;;  %569 = vmatpush.bf16.msrb.mxu3 %v2304_v50  ;;  %v1755_v63 = vld [vmem:[#allocation11 + $0x98] sm:$0xf0]  ;;  %v2323_v0 = vor.u32 %v1885_v61, %v1729_v59  ;;  %v1713_v1 = vld [vmem:[#allocation11 + $0x40] sm:$0xf]  ;;  %v1881_v2 = vld [vmem:[#allocation11 + $0x4c] sm:$0xf0] }
  0x27   :  { %531 = vmatpush.bf16.msrb.mxu0 %v2299_v43  ;;  %v2326_v3 = vor.u32 %v1888_v62, %v1755_v63  ;;  %v1737_v4 = vld [vmem:[#allocation11 + $0x68] sm:$0xf]  ;;  %v1886_v5 = vld [vmem:[#allocation11 + $0x74] sm:$0xf0]  ;;  %v1884_v6 = vld [vmem:[#allocation11 + $0x6c] sm:$0xf]  ;;  %v2339_v15 = vor.u32 %v1881_v2, %v1713_v1 }
  0x28   :  { %557 = vmatpush.bf16.msrb.mxu2 %v2302_v44  ;;  %v2334_v7 = vor.u32 %v1886_v5, %v1737_v4  ;;  %v1739_v8 = vld [vmem:[#allocation11 + $0x78] sm:$0xf0]  ;;  %v1697_v11 = vld [vmem:[#allocation11 + $0x20] sm:$0xf]  ;;  %v1883_v12 = vld [vmem:[#allocation11 + $0x64] sm:$0xf] }
  0x29   :  { %v1731_v13 = vld [vmem:[#allocation11 + $0x70] sm:$0xf0]  ;;  %v1721_v14 = vld [vmem:[#allocation11 + $0x48] sm:$0xf]  ;;  %v2344_v17 = vor.u32 %v1884_v6, %v1739_v8  ;;  %v1882_v20 = vld [vmem:[#allocation11 + $0x54] sm:$0xf0] }
  0x2a   :  { %544 = vmatpush.bf16.msra.mxu1 %v2296_v39  ;;  %570 = vmatpush.bf16.msrb.mxu3 %v2310_v54  ;;  %v2342_v16 = vor.u32 %v1883_v12, %v1731_v13  ;;  %v1880_v21 = vld [vmem:[#allocation11 + $0x4c] sm:$0xf]  ;;  %v2347_v22 = vor.u32 %v1882_v20, %v1721_v14  ;;  %v1723_v23 = vld [vmem:[#allocation11 + $0x58] sm:$0xf0]  ;;  %v1879_v24 = vld [vmem:[#allocation11 + $0x44] sm:$0xf] }
  0x2b   :  { %532 = vmatpush.bf16.msrb.mxu0 %v2315_v58  ;;  %v1715_v25 = vld [vmem:[#allocation11 + $0x50] sm:$0xf0]  ;;  %v1705_v29 = vld [vmem:[#allocation11 + $0x28] sm:$0xf]  ;;  %v1878_v31 = vld [vmem:[#allocation11 + $0x34] sm:$0xf0]  ;;  %v2356_v35 = vor.u32 %v1880_v21, %v1723_v23 }
  0x2c   :  { %558 = vmatpush.bf16.msrb.mxu2 %v2318_v60  ;;  %v2350_v28 = vor.u32 %v1879_v24, %v1715_v25  ;;  %v1681_v34 = vld [vmem:[#allocation11] sm:$0xf]  ;;  %v1873_v37 = vld [vmem:[#allocation11 + $0xc] sm:$0xf0]  ;;  %v2359_v38 = vor.u32 %v1878_v31, %v1705_v29  ;;  %v1876_v40 = vld [vmem:[#allocation11 + $0x2c] sm:$0xf] }
  0x2d   :  { %1664 = vmatmul.msk.bf16.gmra.mxu0 %vm169_vm0, %v2312_v57  ;;  %1667 = vmatmul.msk.bf16.vlgmr.msrb.gmra.mxu1 %vm169_vm0, %v2265_v9  ;;  %v1877_v9 = vld [vmem:[#allocation11 + $0x2c] sm:$0xf0]  ;;  %v1707_v41 = vld [vmem:[#allocation11 + $0x38] sm:$0xf0]  ;;  %v2363_v42 = vor.u32 %v1873_v37, %v1681_v34  ;;  %v1689_v46 = vld [vmem:[#allocation11 + $0x8] sm:$0xf] }
  0x2e   :  { %545 = vmatpush.bf16.msra.mxu1 %v2308_v53  ;;  %1672 = vmatmul.msk.bf16.gmra.mxu2 %vm169_vm0, %v2312_v57  ;;  %v2353_v33 = vor.u32 %v1877_v9, %v1697_v11  ;;  %v2366_v45 = vor.u32 %v1876_v40, %v1707_v41  ;;  %v1874_v47 = vld [vmem:[#allocation11 + $0x14] sm:$0xf0]  ;;  %v1865_v48 = vld [vmem:[#allocation5 + $0x10] sm:$0xff]  ;;  %v1691_v51 = vld [vmem:[#allocation11 + $0x18] sm:$0xf0]  ;;  %s1619_s27 = sshll.u32 %s2792_s6, 4  ;;  %s1620_s27 = int_to_ptr.hbm [resolvable:$true] %s1619_s27 }
  0x2f   :  { %1676 = vmatmul.msk.bf16.gmra.mxu3 %vm169_vm0, %v2312_v57  ;;  %533 = vmatpush.bf16.msrb.mxu0 %v2323_v0  ;;  %v1872_v49 = vld [vmem:[#allocation11 + $0xc] sm:$0xf]  ;;  %v2369_v52 = vor.u32 %v1874_v47, %v1689_v46  ;;  %v1875_v56 = vld [vmem:[#allocation11 + $0x24] sm:$0xf]  ;;  %v1699_v59 = vld [vmem:[#allocation11 + $0x30] sm:$0xf0] }
  0x30   :  { %571 = vmatpush.bf16.msrb.mxu3 %v2326_v3  ;;  %559 = vmatpush.bf16.msrb.mxu2 %v2334_v7  ;;  %v2373_v55 = vor.u32 %v1872_v49, %v1691_v51  ;;  %v2379_v61 = vor.u32 %v1875_v56, %v1699_v59  ;;  %v1871_v62 = vld [vmem:[#allocation11 + $0x4] sm:$0xf]  ;;  %v1683_v63 = vld [vmem:[#allocation11 + $0x10] sm:$0xf0] }
  0x31   :  { %v2386_v1 = vor.u32 %v1871_v62, %v1683_v63 }
  0x32   :  { %546 = vmatpush.bf16.msra.mxu1 %v2342_v16 }
  0x33   :  { %534 = vmatpush.bf16.msrb.mxu0 %v2339_v15 }
  0x34   :  { %572 = vmatpush.bf16.msrb.mxu3 %v2344_v17  ;;  %560 = vmatpush.bf16.msrb.mxu2 %v2347_v22 }
  0x36   :  { %547 = vmatpush.bf16.msra.mxu1 %v2350_v28 }
  0x37   :  { %535 = vmatpush.bf16.msrb.mxu0 %v2353_v33 }
  0x38   :  { %573 = vmatpush.bf16.msrb.mxu3 %v2356_v35  ;;  %561 = vmatpush.bf16.msrb.mxu2 %v2359_v38 }
  0x3a   :  { %548 = vmatpush.bf16.msra.mxu1 %v2379_v61 }
  0x3b   :  { %536 = vmatpush.bf16.msrb.mxu0 %v2363_v42 }
  0x3c   :  { %574 = vmatpush.bf16.msrb.mxu3 %v2366_v45  ;;  %562 = vmatpush.bf16.msrb.mxu2 %v2369_v52 }
  0x3d   :  { %1665 = vmatmul.msk.bf16.gmra.mxu0 %vm169_vm0, %v1865_v48  ;;  %1668 = vmatmul.msk.bf16.gmra.mxu1 %vm169_vm0, %v2312_v57  ;;  %v2213_v57 = vmov 0.0|0.0  }
  0x3e   :  { %1673 = vmatmul.msk.bf16.gmra.mxu2 %vm169_vm0, %v1865_v48  ;;  %549 = vmatpush.bf16.msra.mxu1 %v2386_v1 }
  0x3f   :  { %654 = vmatpush.bf16.msra.mxu0 %v2271_v19  ;;  %1677 = vmatmul.msk.bf16.gmra.mxu3 %vm169_vm0, %v1865_v48 }
  0x40   :  { %575 = vmatpush.bf16.msrb.mxu3 %v2373_v55  ;;  %680 = vmatpush.bf16.msra.mxu2 %v2279_v26 }
  0x42   :  { %667 = vmatpush.bf16.msrb.mxu1 %v2269_v18 }
  0x43   :  { %655 = vmatpush.bf16.msra.mxu0 %v2287_v30 }
  0x44   :  { %693 = vmatpush.bf16.msra.mxu3 %v2292_v36  ;;  %681 = vmatpush.bf16.msra.mxu2 %v2290_v32 }
  0x46   :  { %668 = vmatpush.bf16.msrb.mxu1 %v2284_v27 }
  0x47   :  { %656 = vmatpush.bf16.msra.mxu0 %v2299_v43 }
  0x48   :  { %694 = vmatpush.bf16.msra.mxu3 %v2304_v50  ;;  %682 = vmatpush.bf16.msra.mxu2 %v2302_v44 }
  0x4a   :  { %669 = vmatpush.bf16.msrb.mxu1 %v2296_v39 }
  0x4b   :  { %657 = vmatpush.bf16.msra.mxu0 %v2315_v58 }
  0x4c   :  { %695 = vmatpush.bf16.msra.mxu3 %v2310_v54  ;;  %683 = vmatpush.bf16.msra.mxu2 %v2318_v60 }
  0x4d   :  { %1669 = vmatmul.msk.bf16.gmra.mxu1 %vm169_vm0, %v1865_v48  ;;  %537 = vmatmul.bf16.vlgmr.msrb.gmra.mxu0 %v2213_v57 }
  0x4e   :  { %1674 = vmatmul.msk.bf16.gmra.mxu2 %vm169_vm0, %v2267_v10  ;;  %670 = vmatpush.bf16.msrb.mxu1 %v2308_v53 }
  0x4f   :  { %1678 = vmatmul.msk.bf16.gmra.mxu3 %vm169_vm0, %v2267_v10  ;;  %658 = vmatpush.bf16.msra.mxu0 %v2323_v0 }
  0x50   :  { %696 = vmatpush.bf16.msra.mxu3 %v2326_v3  ;;  %684 = vmatpush.bf16.msra.mxu2 %v2334_v7 }
  0x52   :  { %671 = vmatpush.bf16.msrb.mxu1 %v2342_v16 }
  0x53   :  { %659 = vmatpush.bf16.msra.mxu0 %v2339_v15 }
  0x54   :  { %697 = vmatpush.bf16.msra.mxu3 %v2344_v17  ;;  %685 = vmatpush.bf16.msra.mxu2 %v2347_v22 }
  0x56   :  { %672 = vmatpush.bf16.msrb.mxu1 %v2350_v28 }
  0x57   :  { %660 = vmatpush.bf16.msra.mxu0 %v2353_v33 }
  0x58   :  { %698 = vmatpush.bf16.msra.mxu3 %v2356_v35  ;;  %686 = vmatpush.bf16.msra.mxu2 %v2359_v38 }
  0x5a   :  { %673 = vmatpush.bf16.msrb.mxu1 %v2379_v61 }
  0x5b   :  { %661 = vmatpush.bf16.msra.mxu0 %v2363_v42 }
  0x5c   :  { %699 = vmatpush.bf16.msra.mxu3 %v2366_v45  ;;  %687 = vmatpush.bf16.msra.mxu2 %v2369_v52 }
  0x5d   :  { %1670 = vmatmul.msk.bf16.gmra.mxu1 %vm169_vm0, %v2267_v10  ;;  %v119_v10 = vld [vmem:[#allocation10] sm:$0xf] }
  0x5e   :  { %563 = vmatmul.bf16.vlgmr.msrb.gmra.mxu2 %v2213_v57  ;;  %674 = vmatpush.bf16.msrb.mxu1 %v2386_v1  ;;  %v2459_v2 = vperm.slane %v119_v10, 0  ;;  %v2473_v9 = vperm.slane %v119_v10, 2  ;;  %v2475_v20 = vperm.slane %v119_v10, 3  ;;  %v2488_v40 = vperm.slane %v119_v10, 1 }
  0x5f   :  { %779 = vmatpush.bf16.msrb.mxu0 %v2271_v19  ;;  %576 = vmatmul.bf16.vlgmr.msrb.gmra.mxu3 %v2213_v57 }
  0x60   :  { %700 = vmatpush.bf16.msra.mxu3 %v2373_v55  ;;  %805 = vmatpush.bf16.msrb.mxu2 %v2279_v26  ;;  %2794 = vst [vmem:[#allocation19_spill] sm:$0xff] %v2459_v2 }
  0x63   :  { %780 = vmatpush.bf16.msrb.mxu0 %v2287_v30 }
  0x64   :  { %818 = vmatpush.bf16.msrb.mxu3 %v2292_v36  ;;  %806 = vmatpush.bf16.msrb.mxu2 %v2290_v32 }
  0x67   :  { %781 = vmatpush.bf16.msrb.mxu0 %v2299_v43 }
  0x68   :  { %819 = vmatpush.bf16.msrb.mxu3 %v2304_v50  ;;  %807 = vmatpush.bf16.msrb.mxu2 %v2302_v44 }
  0x6b   :  { %782 = vmatpush.bf16.msrb.mxu0 %v2315_v58 }
  0x6c   :  { %820 = vmatpush.bf16.msrb.mxu3 %v2310_v54  ;;  %808 = vmatpush.bf16.msrb.mxu2 %v2318_v60 }
  0x6d   :  { %550 = vmatmul.bf16.vlgmr.msra.gmra.mxu1 %v2213_v57 }
  0x6e   :  { %792 = vmatpush.bf16.msra.mxu1 %v2269_v18 }
  0x6f   :  { %783 = vmatpush.bf16.msrb.mxu0 %v2323_v0 }
  0x70   :  { %821 = vmatpush.bf16.msrb.mxu3 %v2326_v3  ;;  %809 = vmatpush.bf16.msrb.mxu2 %v2334_v7 }
  0x72   :  { %793 = vmatpush.bf16.msra.mxu1 %v2284_v27 }
  0x73   :  { %784 = vmatpush.bf16.msrb.mxu0 %v2339_v15 }
  0x74   :  { %822 = vmatpush.bf16.msrb.mxu3 %v2344_v17  ;;  %810 = vmatpush.bf16.msrb.mxu2 %v2347_v22 }
  0x76   :  { %794 = vmatpush.bf16.msra.mxu1 %v2296_v39 }
  0x77   :  { %785 = vmatpush.bf16.msrb.mxu0 %v2353_v33 }
  0x78   :  { %823 = vmatpush.bf16.msrb.mxu3 %v2356_v35  ;;  %811 = vmatpush.bf16.msrb.mxu2 %v2359_v38 }
  0x7a   :  { %795 = vmatpush.bf16.msra.mxu1 %v2308_v53 }
  0x7b   :  { %786 = vmatpush.bf16.msrb.mxu0 %v2363_v42 }
  0x7c   :  { %824 = vmatpush.bf16.msrb.mxu3 %v2366_v45  ;;  %812 = vmatpush.bf16.msrb.mxu2 %v2369_v52 }
  0x7e   :  { %796 = vmatpush.bf16.msra.mxu1 %v2342_v16 }
  0x80   :  { %825 = vmatpush.bf16.msrb.mxu3 %v2373_v55 }
  0x82   :  { %797 = vmatpush.bf16.msra.mxu1 %v2350_v28 }
  0x86   :  { %798 = vmatpush.bf16.msra.mxu1 %v2379_v61 }
  0x8a   :  { %799 = vmatpush.bf16.msra.mxu1 %v2386_v1 }
  0x9a   :  { %v191_v4 = vpop.f32.mrf.mxu0  ;;  %v206_v5 = vpop.f32.mrf.mxu1 }
  0x9b   :  { %v2462_v6 = vadd.f32 %v206_v5, %v2459_v2 }
  0x9d   :  { %2795 = vst [vmem:[#allocation20_spill] sm:$0xff] %v2462_v6 }
  0xa1   :  { %v2464_v8 = vpop.f32.mrf.mxu2 }
  0xa2   :  { %v2466_v11 = vpop.f32.mrf.mxu3  ;;  %v193_v12 = vpop.f32.mrf.mxu0 }
  0xa3   :  { %v2469_v13 = vadd.f32 %v193_v12, %v2459_v2  ;;  %v2471_v14 = vpop.f32.mrf.mxu1 }
  0xa4   :  { %2796 = vst [vmem:[#allocation21_spill] sm:$0xff] %v2471_v14 }
  0xa9   :  { %v251_v21 = vpop.f32.mrf.mxu2 }
  0xaa   :  { %v2478_v23 = vadd.f32 %v251_v21, %v2473_v9  ;;  %v280_v24 = vpop.f32.mrf.mxu3  ;;  %v196_v25 = vpop.f32.mrf.mxu0 }
  0xab   :  { %v2481_v29 = vadd.f32 %v280_v24, %v2475_v20  ;;  %v2484_v31 = vadd.f32 %v196_v25, %v2459_v2  ;;  %v2486_v34 = vpop.f32.mrf.mxu1 }
  0xb1   :  { %v254_v37 = vpop.f32.mrf.mxu2 }
  0xb2   :  { %v2491_v41 = vadd.f32 %v254_v37, %v2473_v9  ;;  %v283_v46 = vpop.f32.mrf.mxu3  ;;  %v198_v47 = vpop.f32.mrf.mxu0 }
  0xb3   :  { %v2494_v48 = vadd.f32 %v283_v46, %v2475_v20  ;;  %v2497_v49 = vadd.f32 %v198_v47, %v2459_v2  ;;  %v222_v51 = vpop.f32.mrf.mxu1 }
  0xb4   :  { %v2500_v56 = vadd.f32 %v222_v51, %v2488_v40 }
  0xb9   :  { %v256_v59 = vpop.f32.mrf.mxu2 }
  0xba   :  { %v2503_v62 = vadd.f32 %v256_v59, %v2473_v9  ;;  %v285_v63 = vpop.f32.mrf.mxu3  ;;  %v201_v57 = vpop.f32.mrf.mxu0 }
  0xbb   :  { %v2506_v10 = vadd.f32 %v285_v63, %v2475_v20  ;;  %v2509_v5 = vadd.f32 %v201_v57, %v2459_v2  ;;  %v225_v12 = vpop.f32.mrf.mxu1  ;;  %v192_v57 = vadd.f32 %v191_v4, %v2459_v2 }
  0xbc   :  { %2797 = vst [vmem:[#allocation22_spill] sm:$0xff] %v2503_v62  ;;  %v2512_v21 = vadd.f32 %v225_v12, %v2488_v40 }
  0xbd   :  { %2798 = vst [vmem:[#allocation23_spill] sm:$0xff] %v2506_v10 }
  0xbe   :  { %2799 = vst [vmem:[#allocation24_spill] sm:$0xff] %v2509_v5 }
  0xc1   :  { %v259_v24 = vpop.f32.mrf.mxu2 }
  0xc2   :  { %v2515_v25 = vadd.f32 %v259_v24, %v2473_v9  ;;  %v288_v37 = vpop.f32.mrf.mxu3  ;;  %v203_v46 = vpop.f32.mrf.mxu0 }
  0xc3   :  { %v2518_v47 = vadd.f32 %v288_v37, %v2475_v20  ;;  %v2521_v51 = vadd.f32 %v203_v46, %v2459_v2  ;;  %v227_v59 = vpop.f32.mrf.mxu1 }
  0xc4   :  { %2800 = vst [vmem:[#allocation25_spill] sm:$0xff] %v2515_v25  ;;  %v2524_v63 = vadd.f32 %v227_v59, %v2488_v40 }
  0xc5   :  { %2801 = vst [vmem:[#allocation26_spill] sm:$0xff] %v2518_v47 }
  0xc6   :  { %2802 = vst [vmem:[#allocation27_spill] sm:$0xff] %v2521_v51 }
  0xc9   :  { %v261_v12 = vpop.f32.mrf.mxu2 }
  0xca   :  { %v2528_v14 = vadd.f32 %v261_v12, %v2473_v9  ;;  %v290_v24 = vpop.f32.mrf.mxu3  ;;  %v538_v6 = vpop.f32.mrf.mxu0 }
  0xcb   :  { %v2531_v25 = vadd.f32 %v290_v24, %v2475_v20  ;;  %v230_v37 = vpop.f32.mrf.mxu1  ;;  %v581_v47 = vadd.f32 %v538_v6, %v192_v57 }
  0xcc   :  { %2803 = vst [vmem:[#allocation28_spill] sm:$0xff] %v2528_v14  ;;  %v2534_v46 = vadd.f32 %v230_v37, %v2488_v40 }
  0xcd   :  { %2804 = vst [vmem:[#allocation29_spill] sm:$0xff] %v2531_v25  ;;  %v1807_v51 = vmul.f32 -1.442695, %v581_v47 }
  0xce   :  { %2805 = vst [vmem:[#allocation30_spill] sm:$0xff] %v2534_v46 }
  0xcf   :  { %1924 = vpow2.f32 %v1807_v51 }
  0xd1   :  { %v264_v59 = vpop.f32.mrf.mxu2 }
  0xd2   :  { %v2537_v5 = vadd.f32 %v264_v59, %v2473_v9  ;;  %v293_v4 = vpop.f32.mrf.mxu3  ;;  %v540_v2 = vpop.f32.mrf.mxu0 }
  0xd3   :  { %v2540_v12 = vadd.f32 %v293_v4, %v2475_v20  ;;  %v232_v14 = vpop.f32.mrf.mxu1 }
  0xd4   :  { %2806 = vst [vmem:[#allocation31_spill] sm:$0xff] %v2537_v5  ;;  %v2543_v24 = vadd.f32 %v232_v14, %v2488_v40  ;;  %v250_v14 = vadd.f32 %v2464_v8, %v2473_v9 }
  0xd5   :  { %2807 = vst [vmem:[#allocation32_spill] sm:$0xff] %v2540_v12  ;;  %v1925_v25 = vpop.eup %1924 }
  0xd6   :  { %2808 = vst [vmem:[#allocation33_spill] sm:$0xff] %v2543_v24  ;;  %v594_v6 = vadd.f32 1.0, %v1925_v25  ;;  %v279_v25 = vadd.f32 %v2466_v11, %v2475_v20 }
  0xd8   :  { %1926 = vrcp.f32 %v594_v6  ;;  %v606_v62 = vand.u32 2147483647, %v594_v6  ;;  %vm602_vm2 = vweird.f32 %v594_v6 }
  0xd9   :  { %v266_v57 = vpop.f32.mrf.mxu2 }
  0xda   :  { %v2546_v47 = vadd.f32 %v266_v57, %v2473_v9  ;;  %v295_v51 = vpop.f32.mrf.mxu3  ;;  %vm607_vm4 = vcmp.eq.f32.partialorder %v606_v62, 8.507059e+37 }
  0xdb   :  { %v2549_v37 = vadd.f32 %v295_v51, %v2475_v20  ;;  %v235_v59 = vpop.f32.mrf.mxu1 }
  0xdc   :  { %2809 = vst [vmem:[#allocation34_spill] sm:$0xff] %v2546_v47  ;;  %v2552_v2 = vadd.f32 %v235_v59, %v2488_v40  ;;  %v608_v47 = vand.u32 2147483648, %v594_v6 }
  0xdd   :  { %2810 = vst [vmem:[#allocation35_spill] sm:$0xff] %v2549_v37 }
  0xde   :  { %2811 = vst [vmem:[#allocation36_spill] sm:$0xff] %v2552_v2  ;;  %v1927_v4 = vpop.eup %1926  ;;  %v609_v11 = vor.u32 1.1754944e-38, %v608_v47 }
  0xdf   :  { %v598_v12 = vmul.f32 %v1927_v4, %v594_v6  ;;  %vm603_vm1 = vweird.f32 %v1927_v4 }
  0xe0   :  { %vm604_vm3 = vmor %vm602_vm2, %vm603_vm1 }
  0xe1   :  { %v599_v5 = vsub.f32 1.0, %v598_v12  ;;  %v564_v24 = vpop.f32.mrf.mxu2 }
  0xe2   :  { %v577_v57 = vpop.f32.mrf.mxu3  ;;  %v583_v46 = vadd.f32 %v564_v24, %v250_v14  ;;  %v221_v24 = vadd.f32 %v2486_v34, %v2488_v40 }
  0xe3   :  { %v584_v10 = vadd.f32 %v577_v57, %v279_v25  ;;  %v600_v51 = vmul.f32 %v1927_v4, %v599_v5  ;;  %v237_v37 = vpop.f32.mrf.mxu1 }
  0xe4   :  { %v2559_v59 = vadd.f32 %v237_v37, %v2488_v40  ;;  %v1809_v8 = vmul.f32 -1.442695, %v583_v46 }
  0xe5   :  { %v601_v2 = vadd.f32 %v1927_v4, %v600_v51  ;;  %1928 = vtanh.f32 %v584_v10 }
  0xe6   :  { %2812 = vst [vmem:[#allocation37_spill] sm:$0xff] %v2559_v59  ;;  %1930 = vpow2.f32 %v1809_v8 }
  0xe7   :  { %v605_v9 = vsel %vm604_vm3, %v1927_v4, %v601_v2 }
  0xe8   :  { %v610_v20 = vsel %vm607_vm4, %v609_v11, %v605_v9 }
  0xe9   :  { %v566_v12 = vpop.f32.mrf.mxu2 }
  0xea   :  { %v579_v5 = vpop.f32.mrf.mxu3 }
  0xeb   :  { %v1929_v14 = vpop.eup %1928  ;;  %v551_v25 = vpop.f32.mrf.mxu1 }
  0xec   :  { %v644_v57 = vmul.f32 %v1929_v14, %v610_v20  ;;  %v582_v37 = vadd.f32 %v551_v25, %v221_v24  ;;  %v1931_v6 = vpop.eup %1930 }
  0xed   :  { %v596_v51 = vadd.f32 1.0, %v1931_v6 }
  0xee   :  { %v1808_v59 = vmul.f32 -1.442695, %v582_v37 }
  0xef   :  { %vm632_vm10 = vweird.f32 %v596_v51 }
  0xf0   :  { %1932 = vpow2.f32 %v1808_v59 }
  0xf1   :  { %1934 = vrcp.f32 %v596_v51 }
  0xf3   :  { %v553_v10 = vpop.f32.mrf.mxu1 }
  0xf4   :  { %v638_v10 = vand.u32 2147483648, %v596_v51 }
  0xf6   :  { %v1933_v46 = vpop.eup %1932 }
  0xf7   :  { %v595_v2 = vadd.f32 1.0, %v1933_v46  ;;  %v1935_v62 = vpop.eup %1934  ;;  %v636_v46 = vand.u32 2147483647, %v596_v51 }
  0xf8   :  { %v628_v9 = vmul.f32 %v1935_v62, %v596_v51  ;;  %vm633_vm9 = vweird.f32 %v1935_v62 }
  0xf9   :  { %1936 = vrcp.f32 %v595_v2  ;;  %v623_v40 = vand.u32 2147483648, %v595_v2  ;;  %v621_v8 = vand.u32 2147483647, %v595_v2  ;;  %vm617_vm6 = vweird.f32 %v595_v2  ;;  %vm634_vm11 = vmor %vm632_vm10, %vm633_vm9 }
  0xfa   :  { %v629_v20 = vsub.f32 1.0, %v628_v9  ;;  %v639_v9 = vor.u32 1.1754944e-38, %v638_v10  ;;  %vm637_vm12 = vcmp.eq.f32.partialorder %v636_v46, 8.507059e+37 }
  0xfb   :  { %v624_v59 = vor.u32 1.1754944e-38, %v623_v40  ;;  %vm622_vm8 = vcmp.eq.f32.partialorder %v621_v8, 8.507059e+37 }
  0xfc   :  { %v630_v14 = vmul.f32 %v1935_v62, %v629_v20 }
  0xfe   :  { %v631_v6 = vadd.f32 %v1935_v62, %v630_v14 }
  0xff   :  { %v1937_v47 = vpop.eup %1936 }
 0x100   :  { %v613_v4 = vmul.f32 %v1937_v47, %v595_v2  ;;  %vm618_vm5 = vweird.f32 %v1937_v47 }
 0x101   :  { %vm619_vm7 = vmor %vm617_vm6, %vm618_vm5 }
 0x102   :  { %v614_v34 = vsub.f32 1.0, %v613_v4  ;;  %v635_v4 = vsel %vm634_vm11, %v1935_v62, %v631_v6 }
 0x104   :  { %v615_v11 = vmul.f32 %v1937_v47, %v614_v34  ;;  %v640_v34 = vsel %vm637_vm12, %v639_v9, %v635_v4 }
 0x106   :  { %v616_v12 = vadd.f32 %v1937_v47, %v615_v11 }
 0x108   :  { %v620_v24 = vsel %vm619_vm7, %v1937_v47, %v616_v12 }
 0x109   :  { %v625_v5 = vsel %vm622_vm8, %v624_v59, %v620_v24 }
 0x10a   :  { %v643_v25 = vmul.f32 0.0, %v625_v5 }
 0x10c   :  { %v2563_v37 = vadd.f32 %v644_v57, %v643_v25 }
 0x10e   :  { %1938 = vtanh.f32 %v2563_v37 }
 0x114   :  { %v1939_v2 = vpop.eup %1938 }
 0x115   :  { %v647_v47 = vmul.f32 %v1939_v2, %v640_v34 }
 0x117   :  { %v653_v40 = vpack.c.bf16 %v647_v47, %v647_v47 }
 0x119   :  { %662 = vmatmul.bf16.vlgmr.msra.gmra.mxu0 %v653_v40  ;;  %675 = vmatmul.bf16.vlgmr.msrb.gmra.mxu1 %v653_v40 }
 0x11a   :  { %688 = vmatmul.bf16.vlgmr.msra.gmra.mxu2 %v653_v40  ;;  %701 = vmatmul.bf16.vlgmr.msra.gmra.mxu3 %v653_v40 }
 0x11b   :  { %904 = vmatpush.bf16.msra.mxu0 %v2271_v19  ;;  %917 = vmatpush.bf16.msrb.mxu1 %v2269_v18 }
 0x11c   :  { %930 = vmatpush.bf16.msra.mxu2 %v2279_v26  ;;  %943 = vmatpush.bf16.msra.mxu3 %v2292_v36 }
 0x11f   :  { %905 = vmatpush.bf16.msra.mxu0 %v2287_v30  ;;  %918 = vmatpush.bf16.msrb.mxu1 %v2284_v27 }
 0x120   :  { %931 = vmatpush.bf16.msra.mxu2 %v2290_v32  ;;  %944 = vmatpush.bf16.msra.mxu3 %v2304_v50 }
 0x123   :  { %906 = vmatpush.bf16.msra.mxu0 %v2299_v43  ;;  %919 = vmatpush.bf16.msrb.mxu1 %v2296_v39 }
 0x124   :  { %932 = vmatpush.bf16.msra.mxu2 %v2302_v44  ;;  %945 = vmatpush.bf16.msra.mxu3 %v2310_v54 }
 0x127   :  { %907 = vmatpush.bf16.msra.mxu0 %v2315_v58  ;;  %920 = vmatpush.bf16.msrb.mxu1 %v2308_v53 }
 0x128   :  { %933 = vmatpush.bf16.msra.mxu2 %v2318_v60  ;;  %946 = vmatpush.bf16.msra.mxu3 %v2326_v3 }
 0x12b   :  { %908 = vmatpush.bf16.msra.mxu0 %v2323_v0  ;;  %921 = vmatpush.bf16.msrb.mxu1 %v2342_v16 }
 0x12c   :  { %934 = vmatpush.bf16.msra.mxu2 %v2334_v7  ;;  %947 = vmatpush.bf16.msra.mxu3 %v2344_v17 }
 0x12f   :  { %909 = vmatpush.bf16.msra.mxu0 %v2339_v15  ;;  %922 = vmatpush.bf16.msrb.mxu1 %v2350_v28 }
 0x130   :  { %935 = vmatpush.bf16.msra.mxu2 %v2347_v22  ;;  %948 = vmatpush.bf16.msra.mxu3 %v2356_v35 }
 0x133   :  { %910 = vmatpush.bf16.msra.mxu0 %v2353_v33  ;;  %923 = vmatpush.bf16.msrb.mxu1 %v2379_v61 }
 0x134   :  { %936 = vmatpush.bf16.msra.mxu2 %v2359_v38  ;;  %949 = vmatpush.bf16.msra.mxu3 %v2366_v45 }
 0x137   :  { %911 = vmatpush.bf16.msra.mxu0 %v2363_v42  ;;  %924 = vmatpush.bf16.msrb.mxu1 %v2386_v1 }
 0x138   :  { %937 = vmatpush.bf16.msra.mxu2 %v2369_v52  ;;  %950 = vmatpush.bf16.msra.mxu3 %v2373_v55 }
 0x196   :  { %v663_v57 = vpop.f32.mrf.mxu0  ;;  %v676_v51 = vpop.f32.mrf.mxu1 }
 0x197   :  { %v706_v62 = vadd.f32 %v663_v57, %v2469_v13  ;;  %v707_v11 = vadd.f32 %v676_v51, %v2500_v56 }
 0x199   :  { %v1810_v8 = vmul.f32 -1.442695, %v706_v62  ;;  %v1811_v20 = vmul.f32 -1.442695, %v707_v11 }
 0x19b   :  { %1940 = vpow2.f32 %v1810_v8 }
 0x19c   :  { %1942 = vpow2.f32 %v1811_v20 }
 0x19d   :  { %v689_v12 = vpop.f32.mrf.mxu2  ;;  %v702_v59 = vpop.f32.mrf.mxu3 }
 0x19e   :  { %v708_v24 = vadd.f32 %v689_v12, %v2478_v23  ;;  %v665_v5 = vpop.f32.mrf.mxu0  ;;  %v678_v14 = vpop.f32.mrf.mxu1  ;;  %v709_v47 = vadd.f32 %v702_v59, %v2481_v29 }
 0x1a0   :  { %v1812_v25 = vmul.f32 -1.442695, %v708_v24 }
 0x1a1   :  { %v1941_v6 = vpop.eup %1940 }
 0x1a2   :  { %v1943_v10 = vpop.eup %1942  ;;  %v719_v46 = vadd.f32 1.0, %v1941_v6  ;;  %1944 = vpow2.f32 %v1812_v25 }
 0x1a3   :  { %v720_v4 = vadd.f32 1.0, %v1943_v10 }
 0x1a4   :  { %1946 = vrcp.f32 %v719_v46  ;;  %v733_v11 = vand.u32 2147483648, %v719_v46  ;;  %v731_v12 = vand.u32 2147483647, %v719_v46  ;;  %vm727_vm15 = vweird.f32 %v719_v46 }
 0x1a5   :  { %1948 = vrcp.f32 %v720_v4  ;;  %v691_v13 = vpop.f32.mrf.mxu2  ;;  %v704_v56 = vpop.f32.mrf.mxu3  ;;  %v748_v8 = vand.u32 2147483648, %v720_v4  ;;  %v746_v5 = vand.u32 2147483647, %v720_v4  ;;  %vm742_vm0 = vweird.f32 %v720_v4 }
 0x1a6   :  { %v734_v59 = vor.u32 1.1754944e-38, %v733_v11  ;;  %vm732_vm3 = vcmp.eq.f32.partialorder %v731_v12, 8.507059e+37 }
 0x1a7   :  { %v749_v10 = vor.u32 1.1754944e-38, %v748_v8  ;;  %vm747_vm4 = vcmp.eq.f32.partialorder %v746_v5, 8.507059e+37 }
 0x1a8   :  { %v1945_v9 = vpop.eup %1944 }
 0x1a9   :  { %v721_v2 = vadd.f32 1.0, %v1945_v9 }
 0x1aa   :  { %v1947_v34 = vpop.eup %1946 }
 0x1ab   :  { %v1949_v40 = vpop.eup %1948  ;;  %v723_v57 = vmul.f32 %v1947_v34, %v719_v46  ;;  %1950 = vrcp.f32 %v721_v2  ;;  %vm728_vm13 = vweird.f32 %v1947_v34  ;;  %v763_v11 = vand.u32 2147483648, %v721_v2 }
 0x1ac   :  { %v738_v23 = vmul.f32 %v1949_v40, %v720_v4  ;;  %1952 = vtanh.f32 %v709_v47  ;;  %vm743_vm14 = vweird.f32 %v1949_v40  ;;  %vm729_vm1 = vmor %vm727_vm15, %vm728_vm13  ;;  %vm757_vm6 = vweird.f32 %v721_v2 }
 0x1ad   :  { %v724_v51 = vsub.f32 1.0, %v723_v57  ;;  %vm744_vm2 = vmor %vm742_vm0, %vm743_vm14  ;;  %v764_v12 = vor.u32 1.1754944e-38, %v763_v11 }
 0x1ae   :  { %v739_v62 = vsub.f32 1.0, %v738_v23 }
 0x1af   :  { %v725_v20 = vmul.f32 %v1947_v34, %v724_v51 }
 0x1b0   :  { %v740_v24 = vmul.f32 %v1949_v40, %v739_v62 }
 0x1b1   :  { %v1951_v14 = vpop.eup %1950  ;;  %v726_v25 = vadd.f32 %v1947_v34, %v725_v20 }
 0x1b2   :  { %v753_v29 = vmul.f32 %v1951_v14, %v721_v2  ;;  %v741_v6 = vadd.f32 %v1949_v40, %v740_v24  ;;  %v1953_v56 = vpop.eup %1952  ;;  %vm758_vm5 = vweird.f32 %v1951_v14 }
 0x1b3   :  { %v730_v13 = vsel %vm729_vm1, %v1947_v34, %v726_v25  ;;  %v761_v34 = vand.u32 2147483647, %v721_v2  ;;  %vm759_vm7 = vmor %vm757_vm6, %vm758_vm5 }
 0x1b4   :  { %v754_v9 = vsub.f32 1.0, %v753_v29  ;;  %v735_v47 = vsel %vm732_vm3, %v734_v59, %v730_v13  ;;  %v745_v57 = vsel %vm744_vm2, %v1949_v40, %v741_v6 }
 0x1b5   :  { %v750_v23 = vsel %vm747_vm4, %v749_v10, %v745_v57  ;;  %v769_v51 = vmul.f32 %v1953_v56, %v735_v47  ;;  %vm762_vm8 = vcmp.eq.f32.partialorder %v761_v34, 8.507059e+37 }
 0x1b6   :  { %v768_v62 = vmul.f32 %v750_v23, %v2563_v37  ;;  %v755_v20 = vmul.f32 %v1951_v14, %v754_v9 }
 0x1b8   :  { %v2603_v46 = vadd.f32 %v769_v51, %v768_v62  ;;  %v756_v4 = vadd.f32 %v1951_v14, %v755_v20 }
 0x1ba   :  { %1954 = vtanh.f32 %v2603_v46  ;;  %v760_v8 = vsel %vm759_vm7, %v1951_v14, %v756_v4 }
 0x1bb   :  { %v765_v24 = vsel %vm762_vm8, %v764_v12, %v760_v8 }
 0x1c0   :  { %v1955_v40 = vpop.eup %1954 }
 0x1c1   :  { %v772_v5 = vmul.f32 %v1955_v40, %v765_v24 }
 0x1c3   :  { %v778_v25 = vpack.c.bf16 %v772_v5, %v772_v5 }
 0x1c5   :  { %787 = vmatmul.bf16.vlgmr.msrb.gmra.mxu0 %v778_v25  ;;  %800 = vmatmul.bf16.vlgmr.msra.gmra.mxu1 %v778_v25 }
 0x1c6   :  { %813 = vmatmul.bf16.vlgmr.msrb.gmra.mxu2 %v778_v25  ;;  %826 = vmatmul.bf16.vlgmr.msrb.gmra.mxu3 %v778_v25 }
 0x1c7   :  { %1029 = vmatpush.bf16.msrb.mxu0 %v2271_v19  ;;  %1042 = vmatpush.bf16.msra.mxu1 %v2269_v18 }
 0x1c8   :  { %1055 = vmatpush.bf16.msrb.mxu2 %v2279_v26  ;;  %1068 = vmatpush.bf16.msrb.mxu3 %v2292_v36 }
 0x1cb   :  { %1030 = vmatpush.bf16.msrb.mxu0 %v2287_v30  ;;  %1043 = vmatpush.bf16.msra.mxu1 %v2284_v27 }
 0x1cc   :  { %1056 = vmatpush.bf16.msrb.mxu2 %v2290_v32  ;;  %1069 = vmatpush.bf16.msrb.mxu3 %v2304_v50 }
 0x1cf   :  { %1031 = vmatpush.bf16.msrb.mxu0 %v2299_v43  ;;  %1044 = vmatpush.bf16.msra.mxu1 %v2296_v39 }
 0x1d0   :  { %1057 = vmatpush.bf16.msrb.mxu2 %v2302_v44  ;;  %1070 = vmatpush.bf16.msrb.mxu3 %v2310_v54 }
 0x1d3   :  { %1032 = vmatpush.bf16.msrb.mxu0 %v2315_v58  ;;  %1045 = vmatpush.bf16.msra.mxu1 %v2308_v53 }
 0x1d4   :  { %1058 = vmatpush.bf16.msrb.mxu2 %v2318_v60  ;;  %1071 = vmatpush.bf16.msrb.mxu3 %v2326_v3 }
 0x1d7   :  { %1033 = vmatpush.bf16.msrb.mxu0 %v2323_v0  ;;  %1046 = vmatpush.bf16.msra.mxu1 %v2342_v16 }
 0x1d8   :  { %1059 = vmatpush.bf16.msrb.mxu2 %v2334_v7  ;;  %1072 = vmatpush.bf16.msrb.mxu3 %v2344_v17 }
 0x1db   :  { %1034 = vmatpush.bf16.msrb.mxu0 %v2339_v15  ;;  %1047 = vmatpush.bf16.msra.mxu1 %v2350_v28 }
 0x1dc   :  { %1060 = vmatpush.bf16.msrb.mxu2 %v2347_v22  ;;  %1073 = vmatpush.bf16.msrb.mxu3 %v2356_v35 }
 0x1df   :  { %1035 = vmatpush.bf16.msrb.mxu0 %v2353_v33  ;;  %1048 = vmatpush.bf16.msra.mxu1 %v2379_v61 }
 0x1e0   :  { %1061 = vmatpush.bf16.msrb.mxu2 %v2359_v38  ;;  %1074 = vmatpush.bf16.msrb.mxu3 %v2366_v45 }
 0x1e3   :  { %1036 = vmatpush.bf16.msrb.mxu0 %v2363_v42  ;;  %1049 = vmatpush.bf16.msra.mxu1 %v2386_v1 }
 0x1e4   :  { %1062 = vmatpush.bf16.msrb.mxu2 %v2369_v52  ;;  %1075 = vmatpush.bf16.msrb.mxu3 %v2373_v55 }
 0x242   :  { %v788_v37 = vpop.f32.mrf.mxu0  ;;  %v801_v2 = vpop.f32.mrf.mxu1 }
 0x243   :  { %v831_v14 = vadd.f32 %v788_v37, %v2484_v31  ;;  %v832_v29 = vadd.f32 %v801_v2, %v2512_v21 }
 0x245   :  { %v1813_v59 = vmul.f32 -1.442695, %v831_v14  ;;  %v1814_v6 = vmul.f32 -1.442695, %v832_v29 }
 0x247   :  { %1956 = vpow2.f32 %v1813_v59 }
 0x248   :  { %1958 = vpow2.f32 %v1814_v6 }
 0x249   :  { %v814_v10 = vpop.f32.mrf.mxu2  ;;  %v827_v13 = vpop.f32.mrf.mxu3 }
 0x24a   :  { %v833_v56 = vadd.f32 %v814_v10, %v2491_v41  ;;  %v790_v9 = vpop.f32.mrf.mxu0  ;;  %v803_v47 = vpop.f32.mrf.mxu1  ;;  %v834_v8 = vadd.f32 %v827_v13, %v2494_v48 }
 0x24c   :  { %v1815_v57 = vmul.f32 -1.442695, %v833_v56 }
 0x24d   :  { %v1957_v23 = vpop.eup %1956 }
 0x24e   :  { %v1959_v51 = vpop.eup %1958  ;;  %v844_v62 = vadd.f32 1.0, %v1957_v23  ;;  %1960 = vpow2.f32 %v1815_v57 }
 0x24f   :  { %v845_v20 = vadd.f32 1.0, %v1959_v51 }
 0x250   :  { %1962 = vrcp.f32 %v844_v62  ;;  %v858_v25 = vand.u32 2147483648, %v844_v62  ;;  %v856_v14 = vand.u32 2147483647, %v844_v62  ;;  %vm852_vm11 = vweird.f32 %v844_v62 }
 0x251   :  { %1964 = vrcp.f32 %v845_v20  ;;  %v816_v31 = vpop.f32.mrf.mxu2  ;;  %v829_v21 = vpop.f32.mrf.mxu3  ;;  %v873_v37 = vand.u32 2147483648, %v845_v20  ;;  %v871_v59 = vand.u32 2147483647, %v845_v20  ;;  %vm867_vm12 = vweird.f32 %v845_v20 }
 0x252   :  { %v859_v13 = vor.u32 1.1754944e-38, %v858_v25  ;;  %vm857_vm15 = vcmp.eq.f32.partialorder %v856_v14, 8.507059e+37 }
 0x253   :  { %v874_v9 = vor.u32 1.1754944e-38, %v873_v37  ;;  %vm872_vm0 = vcmp.eq.f32.partialorder %v871_v59, 8.507059e+37 }
 0x254   :  { %v1961_v4 = vpop.eup %1960 }
 0x255   :  { %v846_v11 = vadd.f32 1.0, %v1961_v4 }
 0x256   :  { %v1963_v34 = vpop.eup %1962 }
 0x257   :  { %v1965_v12 = vpop.eup %1964  ;;  %v848_v40 = vmul.f32 %v1963_v34, %v844_v62  ;;  %1966 = vrcp.f32 %v846_v11  ;;  %vm853_vm9 = vweird.f32 %v1963_v34  ;;  %vm882_vm2 = vweird.f32 %v846_v11 }
 0x258   :  { %v863_v41 = vmul.f32 %v1965_v12, %v845_v20  ;;  %1968 = vtanh.f32 %v834_v8  ;;  %vm868_vm10 = vweird.f32 %v1965_v12  ;;  %vm854_vm13 = vmor %vm852_vm11, %vm853_vm9 }
 0x259   :  { %v849_v24 = vsub.f32 1.0, %v848_v40  ;;  %vm869_vm14 = vmor %vm867_vm12, %vm868_vm10 }
 0x25a   :  { %v864_v5 = vsub.f32 1.0, %v863_v41  ;;  %v888_v41 = vand.u32 2147483648, %v846_v11 }
 0x25b   :  { %v850_v2 = vmul.f32 %v1963_v34, %v849_v24 }
 0x25c   :  { %v865_v29 = vmul.f32 %v1965_v12, %v864_v5  ;;  %v889_v5 = vor.u32 1.1754944e-38, %v888_v41 }
 0x25d   :  { %v1967_v6 = vpop.eup %1966  ;;  %v851_v10 = vadd.f32 %v1963_v34, %v850_v2 }
 0x25e   :  { %v878_v48 = vmul.f32 %v1967_v6, %v846_v11  ;;  %v866_v56 = vadd.f32 %v1965_v12, %v865_v29  ;;  %v1969_v57 = vpop.eup %1968  ;;  %vm883_vm1 = vweird.f32 %v1967_v6 }
 0x25f   :  { %v855_v47 = vsel %vm854_vm13, %v1963_v34, %v851_v10  ;;  %v886_v34 = vand.u32 2147483647, %v846_v11  ;;  %vm884_vm3 = vmor %vm882_vm2, %vm883_vm1 }
 0x260   :  { %v879_v23 = vsub.f32 1.0, %v878_v48  ;;  %v860_v51 = vsel %vm857_vm15, %v859_v13, %v855_v47  ;;  %v870_v31 = vsel %vm869_vm14, %v1965_v12, %v866_v56  ;;  %v2813_v13 = vld [vmem:[#allocation22_spill] sm:$0xff] }
 0x261   :  { %v875_v21 = vsel %vm872_vm0, %v874_v9, %v870_v31  ;;  %v894_v4 = vmul.f32 %v1969_v57, %v860_v51  ;;  %vm887_vm4 = vcmp.eq.f32.partialorder %v886_v34, 8.507059e+37 }
 0x262   :  { %v893_v8 = vmul.f32 %v875_v21, %v2603_v46  ;;  %v880_v40 = vmul.f32 %v1967_v6, %v879_v23 }
 0x264   :  { %v2643_v62 = vadd.f32 %v894_v4, %v893_v8  ;;  %v881_v20 = vadd.f32 %v1967_v6, %v880_v40 }
 0x266   :  { %1970 = vtanh.f32 %v2643_v62  ;;  %v885_v24 = vsel %vm884_vm3, %v1967_v6, %v881_v20  ;;  %v2814_v20 = vld [vmem:[#allocation23_spill] sm:$0xff] }
 0x267   :  { %v890_v25 = vsel %vm887_vm4, %v889_v5, %v885_v24 }
 0x26c   :  { %v1971_v12 = vpop.eup %1970 }
 0x26d   :  { %v897_v37 = vmul.f32 %v1971_v12, %v890_v25 }
 0x26f   :  { %v903_v2 = vpack.c.bf16 %v897_v37, %v897_v37 }
 0x271   :  { %912 = vmatmul.bf16.vlgmr.msra.gmra.mxu0 %v903_v2  ;;  %925 = vmatmul.bf16.vlgmr.msrb.gmra.mxu1 %v903_v2 }
 0x272   :  { %938 = vmatmul.bf16.vlgmr.msra.gmra.mxu2 %v903_v2  ;;  %951 = vmatmul.bf16.vlgmr.msra.gmra.mxu3 %v903_v2 }
 0x273   :  { %1154 = vmatpush.bf16.msra.mxu0 %v2271_v19  ;;  %1167 = vmatpush.bf16.msrb.mxu1 %v2269_v18 }
 0x274   :  { %1180 = vmatpush.bf16.msra.mxu2 %v2279_v26  ;;  %1193 = vmatpush.bf16.msra.mxu3 %v2292_v36 }
 0x277   :  { %1155 = vmatpush.bf16.msra.mxu0 %v2287_v30  ;;  %1168 = vmatpush.bf16.msrb.mxu1 %v2284_v27 }
 0x278   :  { %1181 = vmatpush.bf16.msra.mxu2 %v2290_v32  ;;  %1194 = vmatpush.bf16.msra.mxu3 %v2304_v50 }
 0x27b   :  { %1156 = vmatpush.bf16.msra.mxu0 %v2299_v43  ;;  %1169 = vmatpush.bf16.msrb.mxu1 %v2296_v39 }
 0x27c   :  { %1182 = vmatpush.bf16.msra.mxu2 %v2302_v44  ;;  %1195 = vmatpush.bf16.msra.mxu3 %v2310_v54 }
 0x27f   :  { %1157 = vmatpush.bf16.msra.mxu0 %v2315_v58  ;;  %1170 = vmatpush.bf16.msrb.mxu1 %v2308_v53 }
 0x280   :  { %1183 = vmatpush.bf16.msra.mxu2 %v2318_v60  ;;  %1196 = vmatpush.bf16.msra.mxu3 %v2326_v3 }
 0x283   :  { %1158 = vmatpush.bf16.msra.mxu0 %v2323_v0  ;;  %1171 = vmatpush.bf16.msrb.mxu1 %v2342_v16 }
 0x284   :  { %1184 = vmatpush.bf16.msra.mxu2 %v2334_v7  ;;  %1197 = vmatpush.bf16.msra.mxu3 %v2344_v17 }
 0x287   :  { %1159 = vmatpush.bf16.msra.mxu0 %v2339_v15  ;;  %1172 = vmatpush.bf16.msrb.mxu1 %v2350_v28 }
 0x288   :  { %1185 = vmatpush.bf16.msra.mxu2 %v2347_v22  ;;  %1198 = vmatpush.bf16.msra.mxu3 %v2356_v35 }
 0x28b   :  { %1160 = vmatpush.bf16.msra.mxu0 %v2353_v33  ;;  %1173 = vmatpush.bf16.msrb.mxu1 %v2379_v61 }
 0x28c   :  { %1186 = vmatpush.bf16.msra.mxu2 %v2359_v38  ;;  %1199 = vmatpush.bf16.msra.mxu3 %v2366_v45 }
 0x28f   :  { %1161 = vmatpush.bf16.msra.mxu0 %v2363_v42  ;;  %1174 = vmatpush.bf16.msrb.mxu1 %v2386_v1 }
 0x290   :  { %1187 = vmatpush.bf16.msra.mxu2 %v2369_v52  ;;  %1200 = vmatpush.bf16.msra.mxu3 %v2373_v55 }
 0x2ee   :  { %v913_v46 = vpop.f32.mrf.mxu0  ;;  %v926_v11 = vpop.f32.mrf.mxu1 }
 0x2ef   :  { %v956_v14 = vadd.f32 %v913_v46, %v2497_v49  ;;  %v957_v29 = vadd.f32 %v926_v11, %v2524_v63 }
 0x2f1   :  { %v1816_v59 = vmul.f32 -1.442695, %v956_v14  ;;  %v1817_v6 = vmul.f32 -1.442695, %v957_v29 }
 0x2f3   :  { %1972 = vpow2.f32 %v1816_v59 }
 0x2f4   :  { %1974 = vpow2.f32 %v1817_v6 }
 0x2f5   :  { %v939_v10 = vpop.f32.mrf.mxu2  ;;  %v952_v48 = vpop.f32.mrf.mxu3 }
 0x2f6   :  { %v958_v56 = vadd.f32 %v939_v10, %v2813_v13  ;;  %v915_v9 = vpop.f32.mrf.mxu0  ;;  %v928_v47 = vpop.f32.mrf.mxu1  ;;  %v959_v41 = vadd.f32 %v952_v48, %v2814_v20 }
 0x2f8   :  { %v1818_v57 = vmul.f32 -1.442695, %v958_v56 }
 0x2f9   :  { %v1973_v23 = vpop.eup %1972 }
 0x2fa   :  { %v1975_v51 = vpop.eup %1974  ;;  %v969_v31 = vadd.f32 1.0, %v1973_v23  ;;  %1976 = vpow2.f32 %v1818_v57 }
 0x2fb   :  { %v970_v21 = vadd.f32 1.0, %v1975_v51 }
 0x2fc   :  { %1978 = vrcp.f32 %v969_v31  ;;  %v983_v37 = vand.u32 2147483648, %v969_v31  ;;  %v981_v11 = vand.u32 2147483647, %v969_v31  ;;  %vm977_vm7 = vweird.f32 %v969_v31 }
 0x2fd   :  { %1980 = vrcp.f32 %v970_v21  ;;  %v941_v49 = vpop.f32.mrf.mxu2  ;;  %v954_v63 = vpop.f32.mrf.mxu3  ;;  %v998_v2 = vand.u32 2147483648, %v970_v21  ;;  %v996_v29 = vand.u32 2147483647, %v970_v21  ;;  %vm992_vm8 = vweird.f32 %v970_v21 }
 0x2fe   :  { %v984_v48 = vor.u32 1.1754944e-38, %v983_v37  ;;  %vm982_vm11 = vcmp.eq.f32.partialorder %v981_v11, 8.507059e+37  ;;  %v2816_v11 = vld [vmem:[#allocation30_spill] sm:$0xff] }
 0x2ff   :  { %v999_v56 = vor.u32 1.1754944e-38, %v998_v2  ;;  %vm997_vm12 = vcmp.eq.f32.partialorder %v996_v29, 8.507059e+37  ;;  %v2815_v2 = vld [vmem:[#allocation24_spill] sm:$0xff] }
 0x300   :  { %v1977_v4 = vpop.eup %1976 }
 0x301   :  { %v971_v8 = vadd.f32 1.0, %v1977_v4 }
 0x302   :  { %v1979_v40 = vpop.eup %1978 }
 0x303   :  { %v1981_v34 = vpop.eup %1980  ;;  %v973_v24 = vmul.f32 %v1979_v40, %v969_v31  ;;  %1982 = vrcp.f32 %v971_v8  ;;  %vm978_vm5 = vweird.f32 %v1979_v40  ;;  %vm1007_vm14 = vweird.f32 %v971_v8 }
 0x304   :  { %v988_v5 = vmul.f32 %v1981_v34, %v970_v21  ;;  %1984 = vtanh.f32 %v959_v41  ;;  %vm993_vm6 = vweird.f32 %v1981_v34  ;;  %vm979_vm9 = vmor %vm977_vm7, %vm978_vm5  ;;  %v1013_v41 = vand.u32 2147483648, %v971_v8 }
 0x305   :  { %v974_v12 = vsub.f32 1.0, %v973_v24  ;;  %vm994_vm10 = vmor %vm992_vm8, %vm993_vm6 }
 0x306   :  { %v989_v25 = vsub.f32 1.0, %v988_v5  ;;  %v1014_v5 = vor.u32 1.1754944e-38, %v1013_v41 }
 0x307   :  { %v975_v46 = vmul.f32 %v1979_v40, %v974_v12 }
 0x308   :  { %v990_v14 = vmul.f32 %v1981_v34, %v989_v25 }
 0x309   :  { %v1983_v59 = vpop.eup %1982  ;;  %v976_v6 = vadd.f32 %v1979_v40, %v975_v46 }
 0x30a   :  { %v1003_v10 = vmul.f32 %v1983_v59, %v971_v8  ;;  %v991_v13 = vadd.f32 %v1981_v34, %v990_v14  ;;  %v1985_v47 = vpop.eup %1984  ;;  %vm1008_vm13 = vweird.f32 %v1983_v59 }
 0x30b   :  { %v980_v9 = vsel %vm979_vm9, %v1979_v40, %v976_v6  ;;  %v1011_v40 = vand.u32 2147483647, %v971_v8  ;;  %vm1009_vm15 = vmor %vm1007_vm14, %vm1008_vm13 }
 0x30c   :  { %v1004_v57 = vsub.f32 1.0, %v1003_v10  ;;  %v985_v23 = vsel %vm982_vm11, %v984_v48, %v980_v9  ;;  %v995_v51 = vsel %vm994_vm10, %v1981_v34, %v991_v13  ;;  %v2817_v48 = vld [vmem:[#allocation25_spill] sm:$0xff] }
 0x30d   :  { %v1000_v49 = vsel %vm997_vm12, %v999_v56, %v995_v51  ;;  %v1019_v63 = vmul.f32 %v1985_v47, %v985_v23  ;;  %vm1012_vm0 = vcmp.eq.f32.partialorder %v1011_v40, 8.507059e+37  ;;  %v2818_v40 = vld [vmem:[#allocation26_spill] sm:$0xff] }
 0x30e   :  { %v1018_v4 = vmul.f32 %v1000_v49, %v2643_v62  ;;  %v1005_v20 = vmul.f32 %v1983_v59, %v1004_v57 }
 0x310   :  { %v2683_v31 = vadd.f32 %v1019_v63, %v1018_v4  ;;  %v1006_v21 = vadd.f32 %v1983_v59, %v1005_v20 }
 0x312   :  { %1986 = vtanh.f32 %v2683_v31  ;;  %v1010_v24 = vsel %vm1009_vm15, %v1983_v59, %v1006_v21 }
 0x313   :  { %v1015_v12 = vsel %vm1012_vm0, %v1014_v5, %v1010_v24 }
 0x318   :  { %v1987_v34 = vpop.eup %1986 }
 0x319   :  { %v1022_v25 = vmul.f32 %v1987_v34, %v1015_v12 }
 0x31b   :  { %v1028_v37 = vpack.c.bf16 %v1022_v25, %v1022_v25 }
 0x31d   :  { %1037 = vmatmul.bf16.vlgmr.msrb.gmra.mxu0 %v1028_v37  ;;  %1050 = vmatmul.bf16.vlgmr.msra.gmra.mxu1 %v1028_v37 }
 0x31e   :  { %1063 = vmatmul.bf16.vlgmr.msrb.gmra.mxu2 %v1028_v37  ;;  %1076 = vmatmul.bf16.vlgmr.msrb.gmra.mxu3 %v1028_v37 }
 0x31f   :  { %1279 = vmatpush.bf16.msrb.mxu0 %v2271_v19  ;;  %1292 = vmatpush.bf16.msra.mxu1 %v2269_v18 }
 0x320   :  { %1305 = vmatpush.bf16.msrb.mxu2 %v2279_v26  ;;  %1318 = vmatpush.bf16.msrb.mxu3 %v2292_v36 }
 0x323   :  { %1280 = vmatpush.bf16.msrb.mxu0 %v2287_v30  ;;  %1293 = vmatpush.bf16.msra.mxu1 %v2284_v27 }
 0x324   :  { %1306 = vmatpush.bf16.msrb.mxu2 %v2290_v32  ;;  %1319 = vmatpush.bf16.msrb.mxu3 %v2304_v50 }
 0x327   :  { %1281 = vmatpush.bf16.msrb.mxu0 %v2299_v43  ;;  %1294 = vmatpush.bf16.msra.mxu1 %v2296_v39 }
 0x328   :  { %1307 = vmatpush.bf16.msrb.mxu2 %v2302_v44  ;;  %1320 = vmatpush.bf16.msrb.mxu3 %v2310_v54 }
 0x32b   :  { %1282 = vmatpush.bf16.msrb.mxu0 %v2315_v58  ;;  %1295 = vmatpush.bf16.msra.mxu1 %v2308_v53 }
 0x32c   :  { %1308 = vmatpush.bf16.msrb.mxu2 %v2318_v60  ;;  %1321 = vmatpush.bf16.msrb.mxu3 %v2326_v3 }
 0x32f   :  { %1283 = vmatpush.bf16.msrb.mxu0 %v2323_v0  ;;  %1296 = vmatpush.bf16.msra.mxu1 %v2342_v16 }
 0x330   :  { %1309 = vmatpush.bf16.msrb.mxu2 %v2334_v7  ;;  %1322 = vmatpush.bf16.msrb.mxu3 %v2344_v17 }
 0x333   :  { %1284 = vmatpush.bf16.msrb.mxu0 %v2339_v15  ;;  %1297 = vmatpush.bf16.msra.mxu1 %v2350_v28 }
 0x334   :  { %1310 = vmatpush.bf16.msrb.mxu2 %v2347_v22  ;;  %1323 = vmatpush.bf16.msrb.mxu3 %v2356_v35 }
 0x337   :  { %1285 = vmatpush.bf16.msrb.mxu0 %v2353_v33  ;;  %1298 = vmatpush.bf16.msra.mxu1 %v2379_v61 }
 0x338   :  { %1311 = vmatpush.bf16.msrb.mxu2 %v2359_v38  ;;  %1324 = vmatpush.bf16.msrb.mxu3 %v2366_v45 }
 0x33b   :  { %1286 = vmatpush.bf16.msrb.mxu0 %v2363_v42  ;;  %1299 = vmatpush.bf16.msra.mxu1 %v2386_v1 }
 0x33c   :  { %1312 = vmatpush.bf16.msrb.mxu2 %v2369_v52  ;;  %1325 = vmatpush.bf16.msrb.mxu3 %v2373_v55 }
 0x39a   :  { %v1038_v62 = vpop.f32.mrf.mxu0  ;;  %v1051_v8 = vpop.f32.mrf.mxu1 }
 0x39b   :  { %v1081_v46 = vadd.f32 %v1038_v62, %v2815_v2  ;;  %v1082_v14 = vadd.f32 %v1051_v8, %v2816_v11 }
 0x39d   :  { %v1819_v29 = vmul.f32 -1.442695, %v1081_v46  ;;  %v1820_v59 = vmul.f32 -1.442695, %v1082_v14 }
 0x39f   :  { %1988 = vpow2.f32 %v1819_v29 }
 0x3a0   :  { %1990 = vpow2.f32 %v1820_v59 }
 0x3a1   :  { %v1064_v6 = vpop.f32.mrf.mxu2  ;;  %v1077_v10 = vpop.f32.mrf.mxu3 }
 0x3a2   :  { %v1083_v13 = vadd.f32 %v1064_v6, %v2817_v48  ;;  %v1040_v56 = vpop.f32.mrf.mxu0  ;;  %v1053_v9 = vpop.f32.mrf.mxu1  ;;  %v1084_v24 = vadd.f32 %v1077_v10, %v2818_v40 }
 0x3a4   :  { %v1821_v47 = vmul.f32 -1.442695, %v1083_v13 }
 0x3a5   :  { %v1989_v57 = vpop.eup %1988 }
 0x3a6   :  { %v1991_v23 = vpop.eup %1990  ;;  %v1094_v51 = vadd.f32 1.0, %v1989_v57  ;;  %1992 = vpow2.f32 %v1821_v47 }
 0x3a7   :  { %v1095_v49 = vadd.f32 1.0, %v1991_v23 }
 0x3a8   :  { %1994 = vrcp.f32 %v1094_v51  ;;  %v1108_v62 = vand.u32 2147483648, %v1094_v51  ;;  %v1106_v46 = vand.u32 2147483647, %v1094_v51  ;;  %vm1102_vm3 = vweird.f32 %v1094_v51 }
 0x3a9   :  { %1996 = vrcp.f32 %v1095_v49  ;;  %v1066_v63 = vpop.f32.mrf.mxu2  ;;  %v1079_v4 = vpop.f32.mrf.mxu3  ;;  %v1123_v8 = vand.u32 2147483648, %v1095_v49  ;;  %v1121_v14 = vand.u32 2147483647, %v1095_v49  ;;  %vm1117_vm4 = vweird.f32 %v1095_v49 }
 0x3aa   :  { %v1109_v10 = vor.u32 1.1754944e-38, %v1108_v62  ;;  %vm1107_vm7 = vcmp.eq.f32.partialorder %v1106_v46, 8.507059e+37 }
 0x3ab   :  { %v1124_v13 = vor.u32 1.1754944e-38, %v1123_v8  ;;  %vm1122_vm8 = vcmp.eq.f32.partialorder %v1121_v14, 8.507059e+37 }
 0x3ac   :  { %v1993_v20 = vpop.eup %1992 }
 0x3ad   :  { %v1096_v21 = vadd.f32 1.0, %v1993_v20 }
 0x3ae   :  { %v1995_v41 = vpop.eup %1994 }
 0x3af   :  { %v1997_v5 = vpop.eup %1996  ;;  %v1098_v34 = vmul.f32 %v1995_v41, %v1094_v51  ;;  %1998 = vrcp.f32 %v1096_v21  ;;  %vm1103_vm1 = vweird.f32 %v1995_v41  ;;  %vm1132_vm10 = vweird.f32 %v1096_v21 }
 0x3b0   :  { %v1113_v12 = vmul.f32 %v1997_v5, %v1095_v49  ;;  %2000 = vtanh.f32 %v1084_v24  ;;  %vm1118_vm2 = vweird.f32 %v1997_v5  ;;  %vm1104_vm5 = vmor %vm1102_vm3, %vm1103_vm1  ;;  %v1138_v24 = vand.u32 2147483648, %v1096_v21 }
 0x3b1   :  { %v1099_v25 = vsub.f32 1.0, %v1098_v34  ;;  %vm1119_vm6 = vmor %vm1117_vm4, %vm1118_vm2 }
 0x3b2   :  { %v1114_v37 = vsub.f32 1.0, %v1113_v12  ;;  %v1139_v12 = vor.u32 1.1754944e-38, %v1138_v24 }
 0x3b3   :  { %v1100_v2 = vmul.f32 %v1995_v41, %v1099_v25 }
 0x3b4   :  { %v1115_v11 = vmul.f32 %v1997_v5, %v1114_v37 }
 0x3b5   :  { %v1999_v29 = vpop.eup %1998  ;;  %v1101_v59 = vadd.f32 %v1995_v41, %v1100_v2 }
 0x3b6   :  { %v1128_v6 = vmul.f32 %v1999_v29, %v1096_v21  ;;  %v1116_v48 = vadd.f32 %v1997_v5, %v1115_v11  ;;  %v2001_v9 = vpop.eup %2000  ;;  %vm1133_vm9 = vweird.f32 %v1999_v29 }
 0x3b7   :  { %v1105_v56 = vsel %vm1104_vm5, %v1995_v41, %v1101_v59  ;;  %v1136_v41 = vand.u32 2147483647, %v1096_v21  ;;  %vm1134_vm11 = vmor %vm1132_vm10, %vm1133_vm9 }
 0x3b8   :  { %v1129_v47 = vsub.f32 1.0, %v1128_v6  ;;  %v1110_v57 = vsel %vm1107_vm7, %v1109_v10, %v1105_v56  ;;  %v1120_v23 = vsel %vm1119_vm6, %v1997_v5, %v1116_v48 }
 0x3b9   :  { %v1125_v63 = vsel %vm1122_vm8, %v1124_v13, %v1120_v23  ;;  %v1144_v4 = vmul.f32 %v2001_v9, %v1110_v57  ;;  %vm1137_vm12 = vcmp.eq.f32.partialorder %v1136_v41, 8.507059e+37 }
 0x3ba   :  { %v1143_v20 = vmul.f32 %v1125_v63, %v2683_v31  ;;  %v1130_v40 = vmul.f32 %v1999_v29, %v1129_v47 }
 0x3bc   :  { %v2723_v51 = vadd.f32 %v1144_v4, %v1143_v20  ;;  %v1131_v49 = vadd.f32 %v1999_v29, %v1130_v40 }
 0x3be   :  { %2002 = vtanh.f32 %v2723_v51  ;;  %v1135_v34 = vsel %vm1134_vm11, %v1999_v29, %v1131_v49 }
 0x3bf   :  { %v1140_v25 = vsel %vm1137_vm12, %v1139_v12, %v1135_v34 }
 0x3c4   :  { %v2003_v5 = vpop.eup %2002 }
 0x3c5   :  { %v1147_v37 = vmul.f32 %v2003_v5, %v1140_v25 }
 0x3c7   :  { %v1153_v62 = vpack.c.bf16 %v1147_v37, %v1147_v37 }
 0x3c9   :  { %1162 = vmatmul.bf16.vlgmr.msra.gmra.mxu0 %v1153_v62  ;;  %1175 = vmatmul.bf16.vlgmr.msrb.gmra.mxu1 %v1153_v62 }
 0x3ca   :  { %1188 = vmatmul.bf16.vlgmr.msra.gmra.mxu2 %v1153_v62  ;;  %1201 = vmatmul.bf16.vlgmr.msra.gmra.mxu3 %v1153_v62 }
 0x3cb   :  { %1404 = vmatpush.bf16.msra.mxu0 %v2271_v19  ;;  %1417 = vmatpush.bf16.msrb.mxu1 %v2269_v18 }
 0x3cc   :  { %1430 = vmatpush.bf16.msra.mxu2 %v2279_v26  ;;  %1443 = vmatpush.bf16.msra.mxu3 %v2292_v36  ;;  %v2819_v26 = vld [vmem:[#allocation27_spill] sm:$0xff] }
 0x3cf   :  { %1405 = vmatpush.bf16.msra.mxu0 %v2287_v30  ;;  %1418 = vmatpush.bf16.msrb.mxu1 %v2284_v27  ;;  %v2820_v30 = vld [vmem:[#allocation33_spill] sm:$0xff] }
 0x3d0   :  { %1431 = vmatpush.bf16.msra.mxu2 %v2290_v32  ;;  %1444 = vmatpush.bf16.msra.mxu3 %v2304_v50  ;;  %v2821_v50 = vld [vmem:[#allocation28_spill] sm:$0xff] }
 0x3d3   :  { %1406 = vmatpush.bf16.msra.mxu0 %v2299_v43  ;;  %1419 = vmatpush.bf16.msrb.mxu1 %v2296_v39 }
 0x3d4   :  { %1432 = vmatpush.bf16.msra.mxu2 %v2302_v44  ;;  %1445 = vmatpush.bf16.msra.mxu3 %v2310_v54 }
 0x3d7   :  { %1407 = vmatpush.bf16.msra.mxu0 %v2315_v58  ;;  %1420 = vmatpush.bf16.msrb.mxu1 %v2308_v53 }
 0x3d8   :  { %1433 = vmatpush.bf16.msra.mxu2 %v2318_v60  ;;  %1446 = vmatpush.bf16.msra.mxu3 %v2326_v3 }
 0x3db   :  { %1408 = vmatpush.bf16.msra.mxu0 %v2323_v0  ;;  %1421 = vmatpush.bf16.msrb.mxu1 %v2342_v16 }
 0x3dc   :  { %1434 = vmatpush.bf16.msra.mxu2 %v2334_v7  ;;  %1447 = vmatpush.bf16.msra.mxu3 %v2344_v17 }
 0x3df   :  { %1409 = vmatpush.bf16.msra.mxu0 %v2339_v15  ;;  %1422 = vmatpush.bf16.msrb.mxu1 %v2350_v28 }
 0x3e0   :  { %1435 = vmatpush.bf16.msra.mxu2 %v2347_v22  ;;  %1448 = vmatpush.bf16.msra.mxu3 %v2356_v35  ;;  %v2822_v35 = vld [vmem:[#allocation29_spill] sm:$0xff] }
 0x3e3   :  { %1410 = vmatpush.bf16.msra.mxu0 %v2353_v33  ;;  %1423 = vmatpush.bf16.msrb.mxu1 %v2379_v61 }
 0x3e4   :  { %1436 = vmatpush.bf16.msra.mxu2 %v2359_v38  ;;  %1449 = vmatpush.bf16.msra.mxu3 %v2366_v45 }
 0x3e7   :  { %1411 = vmatpush.bf16.msra.mxu0 %v2363_v42  ;;  %1424 = vmatpush.bf16.msrb.mxu1 %v2386_v1 }
 0x3e8   :  { %1437 = vmatpush.bf16.msra.mxu2 %v2369_v52  ;;  %1450 = vmatpush.bf16.msra.mxu3 %v2373_v55 }
 0x446   :  { %v1163_v18 = vpop.f32.mrf.mxu0  ;;  %v1176_v19 = vpop.f32.mrf.mxu1 }
 0x447   :  { %v1206_v27 = vadd.f32 %v1163_v18, %v2819_v26  ;;  %v1207_v32 = vadd.f32 %v1176_v19, %v2820_v30  ;;  %v2823_v18 = vld [vmem:[#allocation20_spill] sm:$0xff] }
 0x448   :  { %v2824_v26 = vld [vmem:[#allocation36_spill] sm:$0xff] }
 0x449   :  { %v1822_v36 = vmul.f32 -1.442695, %v1206_v27  ;;  %v1823_v39 = vmul.f32 -1.442695, %v1207_v32 }
 0x44b   :  { %2004 = vpow2.f32 %v1822_v36 }
 0x44c   :  { %2006 = vpow2.f32 %v1823_v39 }
 0x44d   :  { %v1189_v43 = vpop.f32.mrf.mxu2  ;;  %v1202_v44 = vpop.f32.mrf.mxu3 }
 0x44e   :  { %v1208_v53 = vadd.f32 %v1189_v43, %v2821_v50  ;;  %v1165_v54 = vpop.f32.mrf.mxu0  ;;  %v1178_v58 = vpop.f32.mrf.mxu1  ;;  %v1209_v38 = vadd.f32 %v1202_v44, %v2822_v35  ;;  %v2825_v43 = vld [vmem:[#allocation31_spill] sm:$0xff] }
 0x450   :  { %v1824_v60 = vmul.f32 -1.442695, %v1208_v53 }
 0x451   :  { %v2005_v0 = vpop.eup %2004 }
 0x452   :  { %v2007_v3 = vpop.eup %2006  ;;  %v1219_v7 = vadd.f32 1.0, %v2005_v0  ;;  %2008 = vpow2.f32 %v1824_v60 }
 0x453   :  { %v1220_v15 = vadd.f32 1.0, %v2007_v3 }
 0x454   :  { %2010 = vrcp.f32 %v1219_v7  ;;  %v1233_v1 = vand.u32 2147483648, %v1219_v7  ;;  %v1231_v8 = vand.u32 2147483647, %v1219_v7  ;;  %vm1227_vm15 = vweird.f32 %v1219_v7 }
 0x455   :  { %2012 = vrcp.f32 %v1220_v15  ;;  %v1191_v16 = vpop.f32.mrf.mxu2  ;;  %v1204_v17 = vpop.f32.mrf.mxu3  ;;  %v1248_v31 = vand.u32 2147483648, %v1220_v15  ;;  %v1246_v46 = vand.u32 2147483647, %v1220_v15  ;;  %vm1242_vm0 = vweird.f32 %v1220_v15 }
 0x456   :  { %v1234_v59 = vor.u32 1.1754944e-38, %v1233_v1  ;;  %vm1232_vm3 = vcmp.eq.f32.partialorder %v1231_v8, 8.507059e+37 }
 0x457   :  { %v1249_v10 = vor.u32 1.1754944e-38, %v1248_v31  ;;  %vm1247_vm4 = vcmp.eq.f32.partialorder %v1246_v46, 8.507059e+37 }
 0x458   :  { %v2009_v22 = vpop.eup %2008 }
 0x459   :  { %v1221_v28 = vadd.f32 1.0, %v2009_v22 }
 0x45a   :  { %v2011_v33 = vpop.eup %2010 }
 0x45b   :  { %v2013_v42 = vpop.eup %2012  ;;  %v1223_v45 = vmul.f32 %v2011_v33, %v1219_v7  ;;  %2014 = vrcp.f32 %v1221_v28  ;;  %vm1228_vm13 = vweird.f32 %v2011_v33  ;;  %v1263_v49 = vand.u32 2147483648, %v1221_v28 }
 0x45c   :  { %v1238_v52 = vmul.f32 %v2013_v42, %v1220_v15  ;;  %2016 = vtanh.f32 %v1209_v38  ;;  %vm1243_vm14 = vweird.f32 %v2013_v42  ;;  %vm1229_vm1 = vmor %vm1227_vm15, %vm1228_vm13  ;;  %vm1257_vm6 = vweird.f32 %v1221_v28 }
 0x45d   :  { %v1224_v55 = vsub.f32 1.0, %v1223_v45  ;;  %vm1244_vm2 = vmor %vm1242_vm0, %vm1243_vm14  ;;  %v1261_v24 = vand.u32 2147483647, %v1221_v28  ;;  %v1264_v34 = vor.u32 1.1754944e-38, %v1263_v49 }
 0x45e   :  { %v1239_v61 = vsub.f32 1.0, %v1238_v52 }
 0x45f   :  { %v1225_v21 = vmul.f32 %v2011_v33, %v1224_v55  ;;  %vm1262_vm8 = vcmp.eq.f32.partialorder %v1261_v24, 8.507059e+37 }
 0x460   :  { %v1240_v2 = vmul.f32 %v2013_v42, %v1239_v61 }
 0x461   :  { %v2015_v11 = vpop.eup %2014  ;;  %v1226_v14 = vadd.f32 %v2011_v33, %v1225_v21 }
 0x462   :  { %v1253_v29 = vmul.f32 %v2015_v11, %v1221_v28  ;;  %v1241_v6 = vadd.f32 %v2013_v42, %v1240_v2  ;;  %v2017_v13 = vpop.eup %2016  ;;  %vm1258_vm5 = vweird.f32 %v2015_v11  ;;  %v2826_v28 = vld [vmem:[#allocation32_spill] sm:$0xff] }
 0x463   :  { %v1230_v48 = vsel %vm1229_vm1, %v2011_v33, %v1226_v14  ;;  %vm1259_vm7 = vmor %vm1257_vm6, %vm1258_vm5 }
 0x464   :  { %v1254_v56 = vsub.f32 1.0, %v1253_v29  ;;  %v1235_v9 = vsel %vm1232_vm3, %v1234_v59, %v1230_v48  ;;  %v1245_v47 = vsel %vm1244_vm2, %v2013_v42, %v1241_v6 }
 0x465   :  { %v1250_v57 = vsel %vm1247_vm4, %v1249_v10, %v1245_v47  ;;  %v1269_v23 = vmul.f32 %v2017_v13, %v1235_v9 }
 0x466   :  { %v1268_v63 = vmul.f32 %v1250_v57, %v2723_v51  ;;  %v1255_v4 = vmul.f32 %v2015_v11, %v1254_v56 }
 0x468   :  { %v2763_v20 = vadd.f32 %v1269_v23, %v1268_v63  ;;  %v1256_v40 = vadd.f32 %v2015_v11, %v1255_v4 }
 0x46a   :  { %2018 = vtanh.f32 %v2763_v20  ;;  %v1260_v41 = vsel %vm1259_vm7, %v2015_v11, %v1256_v40 }
 0x46b   :  { %v1265_v5 = vsel %vm1262_vm8, %v1264_v34, %v1260_v41 }
 0x470   :  { %v2019_v12 = vpop.eup %2018 }
 0x471   :  { %v1272_v25 = vmul.f32 %v2019_v12, %v1265_v5 }
 0x473   :  { %v1278_v37 = vpack.c.bf16 %v1272_v25, %v1272_v25 }
 0x475   :  { %1287 = vmatmul.bf16.vlgmr.msrb.gmra.mxu0 %v1278_v37  ;;  %1300 = vmatmul.bf16.vlgmr.msra.gmra.mxu1 %v1278_v37 }
 0x476   :  { %1313 = vmatmul.bf16.vlgmr.msrb.gmra.mxu2 %v1278_v37  ;;  %1326 = vmatmul.bf16.vlgmr.msrb.gmra.mxu3 %v1278_v37  ;;  %v1909_v37 = vld [vmem:[#allocation13 + $0x30] sm:$0xff] }
 0x4f2   :  { %v1288_v51 = vpop.f32.mrf.mxu0  ;;  %v1301_v62 = vpop.f32.mrf.mxu1 }
 0x4f3   :  { %v1331_v19 = vadd.f32 %v1288_v51, %v2823_v18  ;;  %v1332_v27 = vadd.f32 %v1301_v62, %v2824_v26  ;;  %v1908_v51 = vld [vmem:[#allocation13 + $0x28] sm:$0xff]  ;;  %v1907_v62 = vld [vmem:[#allocation13 + $0x20] sm:$0xff]  ;;  %v1906_v18 = vld [vmem:[#allocation13 + $0x18] sm:$0xff] }
 0x4f4   :  { %v2828_v26 = vld [vmem:[#allocation21_spill] sm:$0xff] }
 0x4f5   :  { %v1825_v30 = vmul.f32 -1.442695, %v1331_v19  ;;  %v1826_v32 = vmul.f32 -1.442695, %v1332_v27  ;;  %v2827_v19 = vld [vmem:[#allocation19_spill] sm:$0xff] }
 0x4f6   :  { %v209_v27 = vadd.f32 %v2828_v26, %v2827_v19 }
 0x4f7   :  { %2020 = vpow2.f32 %v1825_v30 }
 0x4f8   :  { %2022 = vpow2.f32 %v1826_v32 }
 0x4f9   :  { %v1314_v36 = vpop.f32.mrf.mxu2  ;;  %v1327_v39 = vpop.f32.mrf.mxu3 }
 0x4fa   :  { %v1333_v44 = vadd.f32 %v1314_v36, %v2825_v43  ;;  %v1290_v50 = vpop.f32.mrf.mxu0  ;;  %v1303_v53 = vpop.f32.mrf.mxu1  ;;  %v1334_v33 = vadd.f32 %v1327_v39, %v2826_v28  ;;  %v2829_v39 = vld [vmem:[#allocation37_spill] sm:$0xff] }
 0x4fc   :  { %v1827_v54 = vmul.f32 -1.442695, %v1333_v44  ;;  %v1905_v44 = vld [vmem:[#allocation13 + $0x10] sm:$0xff] }
 0x4fd   :  { %v2021_v58 = vpop.eup %2020 }
 0x4fe   :  { %v2023_v60 = vpop.eup %2022  ;;  %v1344_v0 = vadd.f32 1.0, %v2021_v58  ;;  %2024 = vpow2.f32 %v1827_v54  ;;  %v1904_v54 = vld [vmem:[#allocation13 + $0x8] sm:$0xff] }
 0x4ff   :  { %v1345_v3 = vadd.f32 1.0, %v2023_v60 }
 0x500   :  { %2026 = vrcp.f32 %v1344_v0  ;;  %v1358_v55 = vand.u32 2147483648, %v1344_v0  ;;  %v1356_v31 = vand.u32 2147483647, %v1344_v0  ;;  %vm1352_vm11 = vweird.f32 %v1344_v0 }
 0x501   :  { %2028 = vrcp.f32 %v1345_v3  ;;  %v1316_v7 = vpop.f32.mrf.mxu2  ;;  %v1329_v15 = vpop.f32.mrf.mxu3  ;;  %v1373_v61 = vand.u32 2147483648, %v1345_v3  ;;  %v1371_v8 = vand.u32 2147483647, %v1345_v3  ;;  %vm1367_vm12 = vweird.f32 %v1345_v3 }
 0x502   :  { %v1359_v14 = vor.u32 1.1754944e-38, %v1358_v55  ;;  %vm1357_vm15 = vcmp.eq.f32.partialorder %v1356_v31, 8.507059e+37 }
 0x503   :  { %v1374_v59 = vor.u32 1.1754944e-38, %v1373_v61  ;;  %vm1372_vm0 = vcmp.eq.f32.partialorder %v1371_v8, 8.507059e+37  ;;  %v2831_v61 = vld [vmem:[#allocation35_spill] sm:$0xff] }
 0x504   :  { %v2025_v16 = vpop.eup %2024 }
 0x505   :  { %v1346_v17 = vadd.f32 1.0, %v2025_v16  ;;  %v1903_v16 = vld [vmem:[#allocation13] sm:$0xff] }
 0x506   :  { %v2027_v22 = vpop.eup %2026 }
 0x507   :  { %v2029_v35 = vpop.eup %2028  ;;  %v1348_v38 = vmul.f32 %v2027_v22, %v1344_v0  ;;  %2030 = vrcp.f32 %v1346_v17  ;;  %vm1353_vm9 = vweird.f32 %v2027_v22  ;;  %v1388_v40 = vand.u32 2147483648, %v1346_v17  ;;  %v2830_v0 = vld [vmem:[#allocation34_spill] sm:$0xff] }
 0x508   :  { %v1363_v42 = vmul.f32 %v2029_v35, %v1345_v3  ;;  %2032 = vtanh.f32 %v1334_v33  ;;  %vm1368_vm10 = vweird.f32 %v2029_v35  ;;  %vm1354_vm13 = vmor %vm1352_vm11, %vm1353_vm9  ;;  %vm1382_vm2 = vweird.f32 %v1346_v17 }
 0x509   :  { %v1349_v45 = vsub.f32 1.0, %v1348_v38  ;;  %vm1369_vm14 = vmor %vm1367_vm12, %vm1368_vm10  ;;  %v1386_v49 = vand.u32 2147483647, %v1346_v17  ;;  %v1389_v41 = vor.u32 1.1754944e-38, %v1388_v40 }
 0x50a   :  { %v1364_v52 = vsub.f32 1.0, %v1363_v42 }
 0x50b   :  { %v1350_v1 = vmul.f32 %v2027_v22, %v1349_v45  ;;  %vm1387_vm4 = vcmp.eq.f32.partialorder %v1386_v49, 8.507059e+37 }
 0x50c   :  { %v1365_v21 = vmul.f32 %v2029_v35, %v1364_v52 }
 0x50d   :  { %v2031_v2 = vpop.eup %2030  ;;  %v1351_v46 = vadd.f32 %v2027_v22, %v1350_v1 }
 0x50e   :  { %v1378_v11 = vmul.f32 %v2031_v2, %v1346_v17  ;;  %v1366_v29 = vadd.f32 %v2029_v35, %v1365_v21  ;;  %v2033_v10 = vpop.eup %2032  ;;  %vm1383_vm1 = vweird.f32 %v2031_v2 }
 0x50f   :  { %v1355_v6 = vsel %vm1354_vm13, %v2027_v22, %v1351_v46  ;;  %vm1384_vm3 = vmor %vm1382_vm2, %vm1383_vm1 }
 0x510   :  { %v1379_v48 = vsub.f32 1.0, %v1378_v11  ;;  %v1360_v13 = vsel %vm1357_vm15, %v1359_v14, %v1355_v6  ;;  %v1370_v56 = vsel %vm1369_vm14, %v2029_v35, %v1366_v29 }
 0x511   :  { %v1375_v9 = vsel %vm1372_vm0, %v1374_v59, %v1370_v56  ;;  %v1394_v47 = vmul.f32 %v2033_v10, %v1360_v13 }
 0x512   :  { %v1393_v57 = vmul.f32 %v1375_v9, %v2763_v20  ;;  %v1380_v23 = vmul.f32 %v2031_v2, %v1379_v48  ;;  %v1910_v20 = vld [vmem:[#allocation13 + $0x38] sm:$0xff] }
 0x513   :  { %1598 = vmatpush.bf16.msrb.mxu0 %v1910_v20 }
 0x514   :  { %v2771_v63 = vadd.f32 %v1394_v47, %v1393_v57  ;;  %v1381_v4 = vadd.f32 %v2031_v2, %v1380_v23 }
 0x516   :  { %2034 = vtanh.f32 %v2771_v63  ;;  %v1385_v24 = vsel %vm1384_vm3, %v2031_v2, %v1381_v4 }
 0x517   :  { %v1390_v12 = vsel %vm1387_vm4, %v1389_v41, %v1385_v24  ;;  %1599 = vmatpush.bf16.msrb.mxu0 %v1909_v37 }
 0x51b   :  { %1600 = vmatpush.bf16.msrb.mxu0 %v1908_v51 }
 0x51c   :  { %v2035_v34 = vpop.eup %2034 }
 0x51d   :  { %v1397_v5 = vmul.f32 %v2035_v34, %v1390_v12 }
 0x51f   :  { %v1403_v25 = vpack.c.bf16 %v1397_v5, %v1397_v5  ;;  %1601 = vmatpush.bf16.msrb.mxu0 %v1907_v62 }
 0x521   :  { %1412 = vmatmul.bf16.vlgmr.msra.gmra.mxu0 %v1403_v25  ;;  %1425 = vmatmul.bf16.vlgmr.msrb.gmra.mxu1 %v1403_v25 }
 0x522   :  { %1438 = vmatmul.bf16.vlgmr.msra.gmra.mxu2 %v1403_v25  ;;  %1451 = vmatmul.bf16.vlgmr.msra.gmra.mxu3 %v1403_v25 }
 0x523   :  { %1602 = vmatpush.bf16.msrb.mxu0 %v1906_v18 }
 0x527   :  { %1603 = vmatpush.bf16.msrb.mxu0 %v1905_v44 }
 0x52b   :  { %1604 = vmatpush.bf16.msrb.mxu0 %v1904_v54 }
 0x52f   :  { %1605 = vmatpush.bf16.msrb.mxu0 %v1903_v16 }
 0x59e   :  { %v1413_v30 = vpop.f32.mrf.mxu0  ;;  %v1426_v32 = vpop.f32.mrf.mxu1 }
 0x59f   :  { %v1456_v36 = vadd.f32 %v1413_v30, %v209_v27  ;;  %v1457_v43 = vadd.f32 %v1426_v32, %v2829_v39 }
 0x5a1   :  { %v1828_v50 = vmul.f32 -1.442695, %v1456_v36  ;;  %v1829_v53 = vmul.f32 -1.442695, %v1457_v43 }
 0x5a3   :  { %2036 = vpow2.f32 %v1828_v50 }
 0x5a4   :  { %2038 = vpow2.f32 %v1829_v53 }
 0x5a5   :  { %v1439_v58 = vpop.f32.mrf.mxu2  ;;  %v1452_v60 = vpop.f32.mrf.mxu3 }
 0x5a6   :  { %v1458_v3 = vadd.f32 %v1439_v58, %v2830_v0  ;;  %v1415_v7 = vpop.f32.mrf.mxu0  ;;  %v1428_v15 = vpop.f32.mrf.mxu1  ;;  %v1459_v1 = vadd.f32 %v1452_v60, %v2831_v61 }
 0x5a8   :  { %v1830_v17 = vmul.f32 -1.442695, %v1458_v3 }
 0x5a9   :  { %v2037_v22 = vpop.eup %2036 }
 0x5aa   :  { %v2039_v28 = vpop.eup %2038  ;;  %v1469_v33 = vadd.f32 1.0, %v2037_v22  ;;  %2040 = vpow2.f32 %v1830_v17 }
 0x5ab   :  { %v1470_v35 = vadd.f32 1.0, %v2039_v28 }
 0x5ac   :  { %2042 = vrcp.f32 %v1469_v33  ;;  %v1483_v11 = vand.u32 2147483648, %v1469_v33  ;;  %v1481_v59 = vand.u32 2147483647, %v1469_v33  ;;  %vm1477_vm7 = vweird.f32 %v1469_v33 }
 0x5ad   :  { %2044 = vrcp.f32 %v1470_v35  ;;  %v1441_v38 = vpop.f32.mrf.mxu2  ;;  %v1454_v42 = vpop.f32.mrf.mxu3  ;;  %v1498_v14 = vand.u32 2147483648, %v1470_v35  ;;  %v1496_v10 = vand.u32 2147483647, %v1470_v35  ;;  %vm1492_vm8 = vweird.f32 %v1470_v35 }
 0x5ae   :  { %v1484_v9 = vor.u32 1.1754944e-38, %v1483_v11  ;;  %vm1482_vm11 = vcmp.eq.f32.partialorder %v1481_v59, 8.507059e+37 }
 0x5af   :  { %v1499_v57 = vor.u32 1.1754944e-38, %v1498_v14  ;;  %vm1497_vm12 = vcmp.eq.f32.partialorder %v1496_v10, 8.507059e+37 }
 0x5b0   :  { %v2041_v45 = vpop.eup %2040 }
 0x5b1   :  { %v1471_v52 = vadd.f32 1.0, %v2041_v45 }
 0x5b2   :  { %v2043_v55 = vpop.eup %2042 }
 0x5b3   :  { %v2045_v31 = vpop.eup %2044  ;;  %v1473_v21 = vmul.f32 %v2043_v55, %v1469_v33  ;;  %2046 = vrcp.f32 %v1471_v52  ;;  %vm1478_vm5 = vweird.f32 %v2043_v55  ;;  %v1513_v37 = vand.u32 2147483648, %v1471_v52 }
 0x5b4   :  { %v1488_v8 = vmul.f32 %v2045_v31, %v1470_v35  ;;  %2048 = vtanh.f32 %v1459_v1  ;;  %vm1493_vm6 = vweird.f32 %v2045_v31  ;;  %vm1479_vm9 = vmor %vm1477_vm7, %vm1478_vm5  ;;  %vm1507_vm14 = vweird.f32 %v1471_v52 }
 0x5b5   :  { %v1474_v2 = vsub.f32 1.0, %v1473_v21  ;;  %vm1494_vm10 = vmor %vm1492_vm8, %vm1493_vm6  ;;  %v1511_v51 = vand.u32 2147483647, %v1471_v52  ;;  %v1514_v18 = vor.u32 1.1754944e-38, %v1513_v37 }
 0x5b6   :  { %v1489_v46 = vsub.f32 1.0, %v1488_v8 }
 0x5b7   :  { %v1475_v29 = vmul.f32 %v2043_v55, %v1474_v2  ;;  %vm1512_vm0 = vcmp.eq.f32.partialorder %v1511_v51, 8.507059e+37 }
 0x5b8   :  { %v1490_v6 = vmul.f32 %v2045_v31, %v1489_v46 }
 0x5b9   :  { %v2047_v48 = vpop.eup %2046  ;;  %v1476_v13 = vadd.f32 %v2043_v55, %v1475_v29 }
 0x5ba   :  { %v1503_v56 = vmul.f32 %v2047_v48, %v1471_v52  ;;  %v1491_v47 = vadd.f32 %v2045_v31, %v1490_v6  ;;  %v2049_v4 = vpop.eup %2048  ;;  %vm1508_vm13 = vweird.f32 %v2047_v48 }
 0x5bb   :  { %v1480_v23 = vsel %vm1479_vm9, %v2043_v55, %v1476_v13  ;;  %vm1509_vm15 = vmor %vm1507_vm14, %vm1508_vm13 }
 0x5bc   :  { %v1504_v40 = vsub.f32 1.0, %v1503_v56  ;;  %v1485_v49 = vsel %vm1482_vm11, %v1484_v9, %v1480_v23  ;;  %v1495_v24 = vsel %vm1494_vm10, %v2045_v31, %v1491_v47 }
 0x5bd   :  { %v1500_v41 = vsel %vm1497_vm12, %v1499_v57, %v1495_v24  ;;  %v1519_v34 = vmul.f32 %v2049_v4, %v1485_v49 }
 0x5be   :  { %v1518_v12 = vmul.f32 %v1500_v41, %v2771_v63  ;;  %v1505_v5 = vmul.f32 %v2047_v48, %v1504_v40  ;;  %v1923_v63 = vld [vmem:[%s2791_s5] ss:$0 sm:$0xff] }
 0x5c0   :  { %v1520_v25 = vadd.f32 %v1519_v34, %v1518_v12  ;;  %v1506_v20 = vadd.f32 %v2047_v48, %v1505_v5 }
 0x5c2   :  { %2050 = vtanh.f32 %v1520_v25  ;;  %v1510_v62 = vsel %vm1509_vm15, %v2047_v48, %v1506_v20 }
 0x5c3   :  { %v1515_v26 = vsel %vm1512_vm0, %v1514_v18, %v1510_v62 }
 0x5c8   :  { %v2051_v19 = vpop.eup %2050 }
 0x5c9   :  { %v1522_v27 = vmul.f32 %v2051_v19, %v1515_v26 }
 0x5cb   :  { %v1529_v30 = vpack.c.bf16 %v1522_v27, %v1522_v27 }
 0x5cd   :  { %1606 = vmatmul.bf16.vlgmr.msrb.gmra.mxu0 %v1529_v30 }
 0x64a   :  { %v1607_v32 = vpop.f32.mrf.mxu0 }
 0x64b   :  { %v1608_v36 = vadd.f32 %v1923_v63, %v1607_v32 }
 0x64d   :  { %1611 = vst [vmem:[#allocation14] sm:$0xff] %v1608_v36 }
 0x64e   :  { %1622 = dma.vmem_to_hbm [thread:$0]  %s1618_s24, 128, %s1620_s27, [#allocation7]  }
 0x652   :  { %v1609_v39 = vpop.f32.mrf.mxu0 }
 0x653   :  { %2202 = dma.done.wait [#allocation7], 128  }
 0x654   :  { %2203 = vsyncadd [#allocation7], 4294967168 }
 0x655   :  { %1627 = vsyncpa [#allocation6], 1 }
 0x656   :  { %1628 = vsyncpa [#allocation9], 1 }
 0x657   :  { %1629 = vsyncpa [#allocation12], 1 }
 0x658   :  { %1630 = vsyncpa [#allocation7], 1 }

</bundles_post_ra>
